<compile_context>
chip_gen: v5e
topology: v5e:2x2
jax: 0.10.0
libtpu: 0.0.40
codegen_flags: <defaults>
</compile_context>

<pallas_src>
import numpy as np
import jax
import jax.numpy as jnp
from jax import lax
from jax.experimental import pallas as pl
from jax.experimental.pallas import tpu as pltpu


# ----------------------------------------------------------------------------
# Host-side constant matrices (built once with numpy; tiny).
# ----------------------------------------------------------------------------
def make_tap_masks(H, W):
    """mask[t, 0, h*W+w] = 1 iff tap t=(oy,ox) reads an in-bounds source pixel."""
    M = np.zeros((9, 1, H * W), np.float32)
    for t in range(9):
        oy, ox = t // 3 - 1, t % 3 - 1
        for h in range(H):
            if not (0 <= h + oy < H):
                continue
            for w in range(W):
                if 0 <= w + ox < W:
                    M[t, 0, h * W + w] = 1.0
    return M


def make_shift_mats(H, W):
    """S[t] (HW,HW): (X @ S[t])[c, h*W+w] = X[c, (h+oy)*W+(w+ox)] or 0 (pad)."""
    HW = H * W
    S = np.zeros((9, HW, HW), np.float32)
    for t in range(9):
        oy, ox = t // 3 - 1, t % 3 - 1
        for h in range(H):
            hh = h + oy
            if not (0 <= hh < H):
                continue
            for w in range(W):
                ww = w + ox
                if 0 <= ww < W:
                    S[t, hh * W + ww, h * W + w] = 1.0
    return S


def make_pool_select(H, W):
    """P (HW, HW/4): selects the top-left pixel of every 2x2 window."""
    Ho, Wo = H // 2, W // 2
    P = np.zeros((H * W, Ho * Wo), np.float32)
    for ho in range(Ho):
        for wo in range(Wo):
            P[(2 * ho) * W + (2 * wo), ho * Wo + wo] = 1.0
    return P


def make_upsample_mat(Hi, Wi):
    """U (Hi*Wi, 4*Hi*Wi): nearest-neighbour x2 upsample as a matmul."""
    Ho, Wo = 2 * Hi, 2 * Wi
    U = np.zeros((Hi * Wi, Ho * Wo), np.float32)
    for h in range(Ho):
        for w in range(Wo):
            U[(h // 2) * Wi + (w // 2), h * Wo + w] = 1.0
    return U


def flatten_conv_weight(w, cin_pad):
    """(kh,kw,Cin,Cout) HWIO -> (Cout, kh*kw*cin_pad), tap-major / cin-minor."""
    kh, kw, cin, cout = w.shape
    wt = jnp.transpose(w, (3, 0, 1, 2)).reshape(cout, kh * kw, cin)
    if cin_pad > cin:
        wt = jnp.pad(wt, ((0, 0), (0, 0), (0, cin_pad - cin)))
    return wt.reshape(cout, kh * kw * cin_pad)


# ----------------------------------------------------------------------------
# Fused UNet-lite forward kernel (one grid step = one image, fully in VMEM).
# ----------------------------------------------------------------------------
def _build_unet_kernel(H, W, Hh, Wh):
    HW = H * W
    OFFS = [(t // 3 - 1, t % 3 - 1) for t in range(9)]
    f32 = jnp.float32

    def conv3x3_roll(x, mask_ref, w_ref, b_ref):
        # Full-res conv: each tap = static lane rotate (XLU) + pad mask (VPU),
        # then ONE fused-K MXU matmul over the stacked im2col matrix.
        taps = []
        for t, (oy, ox) in enumerate(OFFS):
            d = oy * W + ox
            if d == 0:
                taps.append(x)
            else:
                xt = pltpu.roll(x, (-d) % HW, axis=1)   # xt[q] = x[q + d]
                taps.append(xt * mask_ref[t])
        patches = jnp.concatenate(taps, axis=0)          # (9*Cin, HW)
        y = jnp.dot(w_ref[...], patches, preferred_element_type=f32)
        return jnp.maximum(y + b_ref[...], 0.0)          # (Cout, HW)

    def conv3x3_mat(x, shift_ref, w_ref, b_ref):
        # Half-res conv (64-lane activations): keep the shift-matrix im2col.
        taps = [jnp.dot(x, shift_ref[t], preferred_element_type=f32)
                for t in range(9)]
        patches = jnp.concatenate(taps, axis=0)          # (9*Cin, HWq)
        y = jnp.dot(w_ref[...], patches, preferred_element_type=f32)
        return jnp.maximum(y + b_ref[...], 0.0)          # (Cout, HWq)

    def kernel(x_ref, mfull_ref, shalf_ref, psel_ref, up_ref,
               w1a_ref, b1a_ref, w1b_ref, b1b_ref,
               wba_ref, bba_ref, wbb_ref, bbb_ref,
               wd1_ref, bd1_ref, whd_ref, bhd_ref,
               o_ref):
        x0 = x_ref[0]                                            # (Cin_pad, HW)
        e1 = conv3x3_roll(x0, mfull_ref, w1a_ref, b1a_ref)       # (base, HW)
        e1 = conv3x3_roll(e1, mfull_ref, w1b_ref, b1b_ref)       # (base, HW)

        # 2x2 max-pool: window max via lane rolls, then one stride-2 select.
        t1 = jnp.maximum(e1, pltpu.roll(e1, HW - 1, axis=1))     # max(x, x+1)
        t2 = jnp.maximum(t1, pltpu.roll(t1, HW - W, axis=1))     # + next row
        p1 = jnp.dot(t2, psel_ref[...], preferred_element_type=f32)  # (base, HWq)

        bn = conv3x3_mat(p1, shalf_ref, wba_ref, bba_ref)        # (2*base, HWq)
        bn = conv3x3_mat(bn, shalf_ref, wbb_ref, bbb_ref)        # (2*base, HWq)

        up = jnp.dot(bn, up_ref[...], preferred_element_type=f32)  # (2*base, HW)
        cat = jnp.concatenate([up, e1], axis=0)                  # (3*base, HW)
        d1 = conv3x3_roll(cat, mfull_ref, wd1_ref, bd1_ref)      # (base, HW)

        logits = jnp.dot(whd_ref[...], d1, preferred_element_type=f32) + bhd_ref[...]
        o_ref[0] = logits.astype(o_ref.dtype)                    # (ncls, HW)

    return kernel


# ----------------------------------------------------------------------------
# AMIO forward ('unet' backbone) — single pallas_call for the whole network.
# ----------------------------------------------------------------------------
def amio_forward_pallas(params, x_nchw, model_name="unet"):
    if model_name != "unet":
        # TODO(synk): other MODEL_MAP entries (u2net, deeplabv3, ...) are not
        # instantiated — AMIO only ever forwards through the selected backbone.
        raise NotImplementedError(model_name)

    N, Cin, H, W = x_nchw.shape
    HW = H * W
    Hh, Wh = H // 2, W // 2
    HWq = Hh * Wh
    base = params["enc1a"]["w"].shape[-1]
    ncls = params["head"]["w"].shape[-1]
    cin_pad = max(8, -(-Cin // 8) * 8)            # sublane-align input channels

    # Lane-dense activation layout: (N, C, H*W).  NCHW needs no transpose.
    x = x_nchw.reshape(N, Cin, HW)
    if cin_pad > Cin:
        x = jnp.pad(x, ((0, 0), (0, cin_pad - Cin), (0, 0)))

    mask_full = jnp.asarray(make_tap_masks(H, W))             # (9, 1, 256)
    s_half = jnp.asarray(make_shift_mats(Hh, Wh))             # (9, 64, 64)
    p_sel = jnp.asarray(make_pool_select(H, W))               # (256, 64)
    u_up = jnp.asarray(make_upsample_mat(Hh, Wh))             # (64, 256)

    bias = lambda name: params[name]["b"].reshape(-1, 1)
    w1a = flatten_conv_weight(params["enc1a"]["w"], cin_pad)  # (base, 9*cin_pad)
    w1b = flatten_conv_weight(params["enc1b"]["w"], base)
    wba = flatten_conv_weight(params["bottla"]["w"], base)
    wbb = flatten_conv_weight(params["bottlb"]["w"], 2 * base)
    wd1 = flatten_conv_weight(params["dec1"]["w"], 3 * base)
    whd = flatten_conv_weight(params["head"]["w"], base)      # (ncls, base)

    operands = (x, mask_full, s_half, p_sel, u_up,
                w1a, bias("enc1a"), w1b, bias("enc1b"),
                wba, bias("bottla"), wbb, bias("bottlb"),
                wd1, bias("dec1"), whd, bias("head"))

    def _const_spec(a):
        nd = a.ndim
        return pl.BlockSpec(a.shape, lambda n, _nd=nd: (0,) * _nd)

    in_specs = [pl.BlockSpec((1, cin_pad, HW), lambda n: (n, 0, 0))]
    in_specs += [_const_spec(a) for a in operands[1:]]

    # Rough cost hint so XLA schedules the tiny surrounding ops around the call.
    def conv_mm_flops(cin_p, cout, hw):      # fused-K conv matmul
        return 2 * cout * 9 * cin_p * hw

    def shift_mm_flops(cin_p, hw):           # half-res im2col shift matmuls
        return 9 * 2 * cin_p * hw * hw

    flops_img = (conv_mm_flops(cin_pad, base, HW)
                 + conv_mm_flops(base, base, HW)
                 + 2 * base * HW * HWq                         # pool select
                 + shift_mm_flops(base, HWq)
                 + conv_mm_flops(base, 2 * base, HWq)
                 + shift_mm_flops(2 * base, HWq)
                 + conv_mm_flops(2 * base, 2 * base, HWq)
                 + 2 * (2 * base) * HWq * HW                   # upsample
                 + conv_mm_flops(3 * base, base, HW)
                 + 2 * ncls * base * HW)                       # 1x1 head
    flops = N * flops_img
    bytes_accessed = (sum(int(np.prod(a.shape)) * 4 for a in operands)
                      + N * ncls * HW * 4)

    kernel = _build_unet_kernel(H, W, Hh, Wh)

    out = pl.pallas_call(
        kernel,
        out_shape=jax.ShapeDtypeStruct((N, ncls, HW), jnp.float32),
        grid_spec=pltpu.PrefetchScalarGridSpec(
            num_scalar_prefetch=0,
            grid=(N,),
            in_specs=in_specs,
            out_specs=pl.BlockSpec((1, ncls, HW), lambda n: (n, 0, 0)),
        ),
        compiler_params=pltpu.CompilerParams(
            dimension_semantics=("parallel",)),
        cost_estimate=pl.CostEstimate(
            flops=int(flops), transcendentals=0,
            bytes_accessed=int(bytes_accessed)),
    )(*operands)

    return out.reshape(N, ncls, H, W)            # already NCHW; just unflatten


# ----------------------------------------------------------------------------
# Pure-JAX reference (for verification of the fused Pallas kernel).
# ----------------------------------------------------------------------------
def conv2d_ref(x_nhwc, w, b, *, relu):
    y = lax.conv_general_dilated(
        x_nhwc, w, window_strides=(1, 1), padding="SAME",
        dimension_numbers=("NHWC", "HWIO", "NHWC"),
        precision=lax.Precision.HIGHEST)
    y = y + b
    return jnp.maximum(y, 0.0) if relu else y


def maxpool2x2(x):
    N, H, W, C = x.shape
    return x.reshape(N, H // 2, 2, W // 2, 2, C).max(axis=(2, 4))


def upsample2x(x):
    return jnp.repeat(jnp.repeat(x, 2, axis=1), 2, axis=2)


def amio_forward_ref(params, x_nchw):
    x = jnp.transpose(x_nchw, (0, 2, 3, 1))                  # NCHW -> NHWC
    e1 = conv2d_ref(x, params["enc1a"]["w"], params["enc1a"]["b"], relu=True)
    e1 = conv2d_ref(e1, params["enc1b"]["w"], params["enc1b"]["b"], relu=True)
    p1 = maxpool2x2(e1)
    bn = conv2d_ref(p1, params["bottla"]["w"], params["bottla"]["b"], relu=True)
    bn = conv2d_ref(bn, params["bottlb"]["w"], params["bottlb"]["b"], relu=True)
    up = upsample2x(bn)
    cat = jnp.concatenate([up, e1], axis=-1)
    d1 = conv2d_ref(cat, params["dec1"]["w"], params["dec1"]["b"], relu=True)
    logits = conv2d_ref(d1, params["head"]["w"], params["head"]["b"], relu=False)
    return jnp.transpose(logits, (0, 3, 1, 2))               # NHWC -> NCHW


# ----------------------------------------------------------------------------
# Parameter init (deterministic).
# ----------------------------------------------------------------------------
def init_unet_params(key, in_ch, base, num_classes):
    def conv_p(k, kh, kw, cin, cout):
        kw_, kb = jax.random.split(k)
        fan_in = kh * kw * cin
        w = jax.random.normal(kw_, (kh, kw, cin, cout), jnp.float32) / np.sqrt(fan_in)
        b = 0.01 * jax.random.normal(kb, (cout,), jnp.float32)
        return {"w": w, "b": b}

    ks = jax.random.split(key, 6)
    return {
        "enc1a": conv_p(ks[0], 3, 3, in_ch, base),
        "enc1b": conv_p(ks[1], 3, 3, base, base),
        "bottla": conv_p(ks[2], 3, 3, base, 2 * base),
        "bottlb": conv_p(ks[3], 3, 3, 2 * base, 2 * base),
        "dec1": conv_p(ks[4], 3, 3, 3 * base, base),
        "head": conv_p(ks[5], 1, 1, base, num_classes),
    }


if __name__ == "__main__":
    args = {"model_name": "unet", "in_channels": 4, "num_classes": 3,
            "base_filters": 8}
    # TODO(synk): other MODEL_MAP entries (u2net, deeplabv3, ...) are not
    # instantiated — AMIO only ever forwards through the selected backbone.

    key = jax.random.PRNGKey(0)
    pkey, xkey = jax.random.split(key)
    params = init_unet_params(pkey, args["in_channels"], args["base_filters"],
                              args["num_classes"])

    x = jax.random.normal(xkey, (2, args["in_channels"], 16, 16), jnp.float32)

    out = amio_forward_pallas(params, x, model_name=args["model_name"])
    out = jax.block_until_ready(out)

    ref = amio_forward_ref(params, x)
    ref = jax.block_until_ready(ref)

    assert out.shape == (2, args["num_classes"], 16, 16), out.shape
    np.testing.assert_allclose(np.asarray(out), np.asarray(ref),
                               rtol=1e-3, atol=1e-3)
    print("KERNEL_OK")
</pallas_src>

<mosaic_0001>
module attributes {stable_mosaic.version = 11 : i64} {
  func.func @kernel(%arg0: i32, %arg1: memref<1x8x256xf32, #tpu.memory_space<vmem>>, %arg2: memref<9x1x256xf32, #tpu.memory_space<vmem>>, %arg3: memref<9x64x64xf32, #tpu.memory_space<vmem>>, %arg4: memref<256x64xf32, #tpu.memory_space<vmem>>, %arg5: memref<64x256xf32, #tpu.memory_space<vmem>>, %arg6: memref<8x72xf32, #tpu.memory_space<vmem>>, %arg7: memref<8x1xf32, #tpu.memory_space<vmem>>, %arg8: memref<8x72xf32, #tpu.memory_space<vmem>>, %arg9: memref<8x1xf32, #tpu.memory_space<vmem>>, %arg10: memref<16x72xf32, #tpu.memory_space<vmem>>, %arg11: memref<16x1xf32, #tpu.memory_space<vmem>>, %arg12: memref<16x144xf32, #tpu.memory_space<vmem>>, %arg13: memref<16x1xf32, #tpu.memory_space<vmem>>, %arg14: memref<8x216xf32, #tpu.memory_space<vmem>>, %arg15: memref<8x1xf32, #tpu.memory_space<vmem>>, %arg16: memref<3x8xf32, #tpu.memory_space<vmem>>, %arg17: memref<3x1xf32, #tpu.memory_space<vmem>>, %arg18: memref<1x3x256xf32, #tpu.memory_space<vmem>>) attributes {dimension_semantics = [#tpu.dimension_semantics<parallel>], iteration_bounds = array<i64: 2>, scalar_prefetch = 0 : i64, scratch_operands = 0 : i64, tpu.core_type = #tpu.core_type<tc>, window_params = [{transform_indices = @transform_0, window_bounds = array<i64: 1, 8, 256>}, {pipeline_mode = #tpu.pipeline_mode<synchronous>, transform_indices = @transform_1, window_bounds = array<i64: 9, 1, 256>}, {pipeline_mode = #tpu.pipeline_mode<synchronous>, transform_indices = @transform_2, window_bounds = array<i64: 9, 64, 64>}, {pipeline_mode = #tpu.pipeline_mode<synchronous>, transform_indices = @transform_3, window_bounds = array<i64: 256, 64>}, {pipeline_mode = #tpu.pipeline_mode<synchronous>, transform_indices = @transform_4, window_bounds = array<i64: 64, 256>}, {pipeline_mode = #tpu.pipeline_mode<synchronous>, transform_indices = @transform_5, window_bounds = array<i64: 8, 72>}, {pipeline_mode = #tpu.pipeline_mode<synchronous>, transform_indices = @transform_6, window_bounds = array<i64: 8, 1>}, {pipeline_mode = #tpu.pipeline_mode<synchronous>, transform_indices = @transform_7, window_bounds = array<i64: 8, 72>}, {pipeline_mode = #tpu.pipeline_mode<synchronous>, transform_indices = @transform_8, window_bounds = array<i64: 8, 1>}, {pipeline_mode = #tpu.pipeline_mode<synchronous>, transform_indices = @transform_9, window_bounds = array<i64: 16, 72>}, {pipeline_mode = #tpu.pipeline_mode<synchronous>, transform_indices = @transform_10, window_bounds = array<i64: 16, 1>}, {pipeline_mode = #tpu.pipeline_mode<synchronous>, transform_indices = @transform_11, window_bounds = array<i64: 16, 144>}, {pipeline_mode = #tpu.pipeline_mode<synchronous>, transform_indices = @transform_12, window_bounds = array<i64: 16, 1>}, {pipeline_mode = #tpu.pipeline_mode<synchronous>, transform_indices = @transform_13, window_bounds = array<i64: 8, 216>}, {pipeline_mode = #tpu.pipeline_mode<synchronous>, transform_indices = @transform_14, window_bounds = array<i64: 8, 1>}, {pipeline_mode = #tpu.pipeline_mode<synchronous>, transform_indices = @transform_15, window_bounds = array<i64: 3, 8>}, {pipeline_mode = #tpu.pipeline_mode<synchronous>, transform_indices = @transform_16, window_bounds = array<i64: 3, 1>}, {transform_indices = @transform_17, window_bounds = array<i64: 1, 3, 256>}]} {
    %c0 = arith.constant 0 : index
    %c0_0 = arith.constant 0 : index
    %c0_1 = arith.constant 0 : index
    %0 = vector.load %arg1[%c0, %c0_0, %c0_1] : memref<1x8x256xf32, #tpu.memory_space<vmem>>, vector<1x8x256xf32>
    %1 = vector.shape_cast %0 : vector<1x8x256xf32> to vector<8x256xf32>
    %c17_i32 = arith.constant 17 : i32
    %2 = tpu.dynamic_rotate %1 by %c17_i32 dim 1 : vector<8x256xf32>, i32 -> vector<8x256xf32>
    %c0_2 = arith.constant 0 : index
    %c0_3 = arith.constant 0 : index
    %c0_4 = arith.constant 0 : index
    %3 = vector.load %arg2[%c0_2, %c0_3, %c0_4] : memref<9x1x256xf32, #tpu.memory_space<vmem>>, vector<1x1x256xf32>
    %4 = vector.shape_cast %3 : vector<1x1x256xf32> to vector<1x256xf32>
    %5 = vector.broadcast %4 : vector<1x256xf32> to vector<8x256xf32>
    %6 = arith.mulf %2, %5 : vector<8x256xf32>
    %c16_i32 = arith.constant 16 : i32
    %7 = tpu.dynamic_rotate %1 by %c16_i32 dim 1 : vector<8x256xf32>, i32 -> vector<8x256xf32>
    %c1 = arith.constant 1 : index
    %c0_5 = arith.constant 0 : index
    %c0_6 = arith.constant 0 : index
    %8 = vector.load %arg2[%c1, %c0_5, %c0_6] : memref<9x1x256xf32, #tpu.memory_space<vmem>>, vector<1x1x256xf32>
    %9 = vector.shape_cast %8 : vector<1x1x256xf32> to vector<1x256xf32>
    %10 = vector.broadcast %9 : vector<1x256xf32> to vector<8x256xf32>
    %11 = arith.mulf %7, %10 : vector<8x256xf32>
    %c15_i32 = arith.constant 15 : i32
    %12 = tpu.dynamic_rotate %1 by %c15_i32 dim 1 : vector<8x256xf32>, i32 -> vector<8x256xf32>
    %c2 = arith.constant 2 : index
    %c0_7 = arith.constant 0 : index
    %c0_8 = arith.constant 0 : index
    %13 = vector.load %arg2[%c2, %c0_7, %c0_8] : memref<9x1x256xf32, #tpu.memory_space<vmem>>, vector<1x1x256xf32>
    %14 = vector.shape_cast %13 : vector<1x1x256xf32> to vector<1x256xf32>
    %15 = vector.broadcast %14 : vector<1x256xf32> to vector<8x256xf32>
    %16 = arith.mulf %12, %15 : vector<8x256xf32>
    %c1_i32 = arith.constant 1 : i32
    %17 = tpu.dynamic_rotate %1 by %c1_i32 dim 1 : vector<8x256xf32>, i32 -> vector<8x256xf32>
    %c3 = arith.constant 3 : index
    %c0_9 = arith.constant 0 : index
    %c0_10 = arith.constant 0 : index
    %18 = vector.load %arg2[%c3, %c0_9, %c0_10] : memref<9x1x256xf32, #tpu.memory_space<vmem>>, vector<1x1x256xf32>
    %19 = vector.shape_cast %18 : vector<1x1x256xf32> to vector<1x256xf32>
    %20 = vector.broadcast %19 : vector<1x256xf32> to vector<8x256xf32>
    %21 = arith.mulf %17, %20 : vector<8x256xf32>
    %c255_i32 = arith.constant 255 : i32
    %22 = tpu.dynamic_rotate %1 by %c255_i32 dim 1 : vector<8x256xf32>, i32 -> vector<8x256xf32>
    %c5 = arith.constant 5 : index
    %c0_11 = arith.constant 0 : index
    %c0_12 = arith.constant 0 : index
    %23 = vector.load %arg2[%c5, %c0_11, %c0_12] : memref<9x1x256xf32, #tpu.memory_space<vmem>>, vector<1x1x256xf32>
    %24 = vector.shape_cast %23 : vector<1x1x256xf32> to vector<1x256xf32>
    %25 = vector.broadcast %24 : vector<1x256xf32> to vector<8x256xf32>
    %26 = arith.mulf %22, %25 : vector<8x256xf32>
    %c241_i32 = arith.constant 241 : i32
    %27 = tpu.dynamic_rotate %1 by %c241_i32 dim 1 : vector<8x256xf32>, i32 -> vector<8x256xf32>
    %c6 = arith.constant 6 : index
    %c0_13 = arith.constant 0 : index
    %c0_14 = arith.constant 0 : index
    %28 = vector.load %arg2[%c6, %c0_13, %c0_14] : memref<9x1x256xf32, #tpu.memory_space<vmem>>, vector<1x1x256xf32>
    %29 = vector.shape_cast %28 : vector<1x1x256xf32> to vector<1x256xf32>
    %30 = vector.broadcast %29 : vector<1x256xf32> to vector<8x256xf32>
    %31 = arith.mulf %27, %30 : vector<8x256xf32>
    %c240_i32 = arith.constant 240 : i32
    %32 = tpu.dynamic_rotate %1 by %c240_i32 dim 1 : vector<8x256xf32>, i32 -> vector<8x256xf32>
    %c7 = arith.constant 7 : index
    %c0_15 = arith.constant 0 : index
    %c0_16 = arith.constant 0 : index
    %33 = vector.load %arg2[%c7, %c0_15, %c0_16] : memref<9x1x256xf32, #tpu.memory_space<vmem>>, vector<1x1x256xf32>
    %34 = vector.shape_cast %33 : vector<1x1x256xf32> to vector<1x256xf32>
    %35 = vector.broadcast %34 : vector<1x256xf32> to vector<8x256xf32>
    %36 = arith.mulf %32, %35 : vector<8x256xf32>
    %c239_i32 = arith.constant 239 : i32
    %37 = tpu.dynamic_rotate %1 by %c239_i32 dim 1 : vector<8x256xf32>, i32 -> vector<8x256xf32>
    %c8 = arith.constant 8 : index
    %c0_17 = arith.constant 0 : index
    %c0_18 = arith.constant 0 : index
    %38 = vector.load %arg2[%c8, %c0_17, %c0_18] : memref<9x1x256xf32, #tpu.memory_space<vmem>>, vector<1x1x256xf32>
    %39 = vector.shape_cast %38 : vector<1x1x256xf32> to vector<1x256xf32>
    %40 = vector.broadcast %39 : vector<1x256xf32> to vector<8x256xf32>
    %41 = arith.mulf %37, %40 : vector<8x256xf32>
    %42 = tpu.concatenate %6, %11, %16, %21, %1, %26, %31, %36, %41 in 0 : vector<8x256xf32>, vector<8x256xf32>, vector<8x256xf32>, vector<8x256xf32>, vector<8x256xf32>, vector<8x256xf32>, vector<8x256xf32>, vector<8x256xf32>, vector<8x256xf32> -> vector<72x256xf32>
    %c0_19 = arith.constant 0 : index
    %c0_20 = arith.constant 0 : index
    %43 = vector.load %arg6[%c0_19, %c0_20] : memref<8x72xf32, #tpu.memory_space<vmem>>, vector<8x72xf32>
    %cst = arith.constant dense<0.000000e+00> : vector<8x256xf32>
    %44 = tpu.matmul %43, %42, %cst {dimension_numbers = #tpu.dot_dimension_numbers<[1], [0], [0], [1], [0, 0, 1, 1], [], []>} : vector<8x72xf32>, vector<72x256xf32>, vector<8x256xf32> -> vector<8x256xf32>
    %c0_21 = arith.constant 0 : index
    %c0_22 = arith.constant 0 : index
    %45 = vector.load %arg7[%c0_21, %c0_22] : memref<8x1xf32, #tpu.memory_space<vmem>>, vector<8x1xf32>
    %46 = vector.broadcast %45 : vector<8x1xf32> to vector<8x256xf32>
    %47 = arith.addf %44, %46 : vector<8x256xf32>
    %cst_23 = arith.constant 0.000000e+00 : f32
    %48 = vector.broadcast %cst_23 : f32 to vector<8x256xf32>
    %49 = arith.maximumf %47, %48 : vector<8x256xf32>
    %c17_i32_24 = arith.constant 17 : i32
    %50 = tpu.dynamic_rotate %49 by %c17_i32_24 dim 1 : vector<8x256xf32>, i32 -> vector<8x256xf32>
    %c0_25 = arith.constant 0 : index
    %c0_26 = arith.constant 0 : index
    %c0_27 = arith.constant 0 : index
    %51 = vector.load %arg2[%c0_25, %c0_26, %c0_27] : memref<9x1x256xf32, #tpu.memory_space<vmem>>, vector<1x1x256xf32>
    %52 = vector.shape_cast %51 : vector<1x1x256xf32> to vector<1x256xf32>
    %53 = vector.broadcast %52 : vector<1x256xf32> to vector<8x256xf32>
    %54 = arith.mulf %50, %53 : vector<8x256xf32>
    %c16_i32_28 = arith.constant 16 : i32
    %55 = tpu.dynamic_rotate %49 by %c16_i32_28 dim 1 : vector<8x256xf32>, i32 -> vector<8x256xf32>
    %c1_29 = arith.constant 1 : index
    %c0_30 = arith.constant 0 : index
    %c0_31 = arith.constant 0 : index
    %56 = vector.load %arg2[%c1_29, %c0_30, %c0_31] : memref<9x1x256xf32, #tpu.memory_space<vmem>>, vector<1x1x256xf32>
    %57 = vector.shape_cast %56 : vector<1x1x256xf32> to vector<1x256xf32>
    %58 = vector.broadcast %57 : vector<1x256xf32> to vector<8x256xf32>
    %59 = arith.mulf %55, %58 : vector<8x256xf32>
    %c15_i32_32 = arith.constant 15 : i32
    %60 = tpu.dynamic_rotate %49 by %c15_i32_32 dim 1 : vector<8x256xf32>, i32 -> vector<8x256xf32>
    %c2_33 = arith.constant 2 : index
    %c0_34 = arith.constant 0 : index
    %c0_35 = arith.constant 0 : index
    %61 = vector.load %arg2[%c2_33, %c0_34, %c0_35] : memref<9x1x256xf32, #tpu.memory_space<vmem>>, vector<1x1x256xf32>
    %62 = vector.shape_cast %61 : vector<1x1x256xf32> to vector<1x256xf32>
    %63 = vector.broadcast %62 : vector<1x256xf32> to vector<8x256xf32>
    %64 = arith.mulf %60, %63 : vector<8x256xf32>
    %c1_i32_36 = arith.constant 1 : i32
    %65 = tpu.dynamic_rotate %49 by %c1_i32_36 dim 1 : vector<8x256xf32>, i32 -> vector<8x256xf32>
    %c3_37 = arith.constant 3 : index
    %c0_38 = arith.constant 0 : index
    %c0_39 = arith.constant 0 : index
    %66 = vector.load %arg2[%c3_37, %c0_38, %c0_39] : memref<9x1x256xf32, #tpu.memory_space<vmem>>, vector<1x1x256xf32>
    %67 = vector.shape_cast %66 : vector<1x1x256xf32> to vector<1x256xf32>
    %68 = vector.broadcast %67 : vector<1x256xf32> to vector<8x256xf32>
    %69 = arith.mulf %65, %68 : vector<8x256xf32>
    %c255_i32_40 = arith.constant 255 : i32
    %70 = tpu.dynamic_rotate %49 by %c255_i32_40 dim 1 : vector<8x256xf32>, i32 -> vector<8x256xf32>
    %c5_41 = arith.constant 5 : index
    %c0_42 = arith.constant 0 : index
    %c0_43 = arith.constant 0 : index
    %71 = vector.load %arg2[%c5_41, %c0_42, %c0_43] : memref<9x1x256xf32, #tpu.memory_space<vmem>>, vector<1x1x256xf32>
    %72 = vector.shape_cast %71 : vector<1x1x256xf32> to vector<1x256xf32>
    %73 = vector.broadcast %72 : vector<1x256xf32> to vector<8x256xf32>
    %74 = arith.mulf %70, %73 : vector<8x256xf32>
    %c241_i32_44 = arith.constant 241 : i32
    %75 = tpu.dynamic_rotate %49 by %c241_i32_44 dim 1 : vector<8x256xf32>, i32 -> vector<8x256xf32>
    %c6_45 = arith.constant 6 : index
    %c0_46 = arith.constant 0 : index
    %c0_47 = arith.constant 0 : index
    %76 = vector.load %arg2[%c6_45, %c0_46, %c0_47] : memref<9x1x256xf32, #tpu.memory_space<vmem>>, vector<1x1x256xf32>
    %77 = vector.shape_cast %76 : vector<1x1x256xf32> to vector<1x256xf32>
    %78 = vector.broadcast %77 : vector<1x256xf32> to vector<8x256xf32>
    %79 = arith.mulf %75, %78 : vector<8x256xf32>
    %c240_i32_48 = arith.constant 240 : i32
    %80 = tpu.dynamic_rotate %49 by %c240_i32_48 dim 1 : vector<8x256xf32>, i32 -> vector<8x256xf32>
    %c7_49 = arith.constant 7 : index
    %c0_50 = arith.constant 0 : index
    %c0_51 = arith.constant 0 : index
    %81 = vector.load %arg2[%c7_49, %c0_50, %c0_51] : memref<9x1x256xf32, #tpu.memory_space<vmem>>, vector<1x1x256xf32>
    %82 = vector.shape_cast %81 : vector<1x1x256xf32> to vector<1x256xf32>
    %83 = vector.broadcast %82 : vector<1x256xf32> to vector<8x256xf32>
    %84 = arith.mulf %80, %83 : vector<8x256xf32>
    %c239_i32_52 = arith.constant 239 : i32
    %85 = tpu.dynamic_rotate %49 by %c239_i32_52 dim 1 : vector<8x256xf32>, i32 -> vector<8x256xf32>
    %c8_53 = arith.constant 8 : index
    %c0_54 = arith.constant 0 : index
    %c0_55 = arith.constant 0 : index
    %86 = vector.load %arg2[%c8_53, %c0_54, %c0_55] : memref<9x1x256xf32, #tpu.memory_space<vmem>>, vector<1x1x256xf32>
    %87 = vector.shape_cast %86 : vector<1x1x256xf32> to vector<1x256xf32>
    %88 = vector.broadcast %87 : vector<1x256xf32> to vector<8x256xf32>
    %89 = arith.mulf %85, %88 : vector<8x256xf32>
    %90 = tpu.concatenate %54, %59, %64, %69, %49, %74, %79, %84, %89 in 0 : vector<8x256xf32>, vector<8x256xf32>, vector<8x256xf32>, vector<8x256xf32>, vector<8x256xf32>, vector<8x256xf32>, vector<8x256xf32>, vector<8x256xf32>, vector<8x256xf32> -> vector<72x256xf32>
    %c0_56 = arith.constant 0 : index
    %c0_57 = arith.constant 0 : index
    %91 = vector.load %arg8[%c0_56, %c0_57] : memref<8x72xf32, #tpu.memory_space<vmem>>, vector<8x72xf32>
    %cst_58 = arith.constant dense<0.000000e+00> : vector<8x256xf32>
    %92 = tpu.matmul %91, %90, %cst_58 {dimension_numbers = #tpu.dot_dimension_numbers<[1], [0], [0], [1], [0, 0, 1, 1], [], []>} : vector<8x72xf32>, vector<72x256xf32>, vector<8x256xf32> -> vector<8x256xf32>
    %c0_59 = arith.constant 0 : index
    %c0_60 = arith.constant 0 : index
    %93 = vector.load %arg9[%c0_59, %c0_60] : memref<8x1xf32, #tpu.memory_space<vmem>>, vector<8x1xf32>
    %94 = vector.broadcast %93 : vector<8x1xf32> to vector<8x256xf32>
    %95 = arith.addf %92, %94 : vector<8x256xf32>
    %cst_61 = arith.constant 0.000000e+00 : f32
    %96 = vector.broadcast %cst_61 : f32 to vector<8x256xf32>
    %97 = arith.maximumf %95, %96 : vector<8x256xf32>
    %c255_i32_62 = arith.constant 255 : i32
    %98 = tpu.dynamic_rotate %97 by %c255_i32_62 dim 1 : vector<8x256xf32>, i32 -> vector<8x256xf32>
    %99 = arith.maximumf %97, %98 : vector<8x256xf32>
    %c240_i32_63 = arith.constant 240 : i32
    %100 = tpu.dynamic_rotate %99 by %c240_i32_63 dim 1 : vector<8x256xf32>, i32 -> vector<8x256xf32>
    %101 = arith.maximumf %99, %100 : vector<8x256xf32>
    %c0_64 = arith.constant 0 : index
    %c0_65 = arith.constant 0 : index
    %102 = vector.load %arg4[%c0_64, %c0_65] : memref<256x64xf32, #tpu.memory_space<vmem>>, vector<256x64xf32>
    %cst_66 = arith.constant dense<0.000000e+00> : vector<8x64xf32>
    %103 = tpu.matmul %101, %102, %cst_66 {dimension_numbers = #tpu.dot_dimension_numbers<[1], [0], [0], [1], [0, 0, 1, 1], [], []>} : vector<8x256xf32>, vector<256x64xf32>, vector<8x64xf32> -> vector<8x64xf32>
    %c0_67 = arith.constant 0 : index
    %c0_68 = arith.constant 0 : index
    %c0_69 = arith.constant 0 : index
    %104 = vector.load %arg3[%c0_67, %c0_68, %c0_69] : memref<9x64x64xf32, #tpu.memory_space<vmem>>, vector<1x64x64xf32>
    %105 = vector.shape_cast %104 : vector<1x64x64xf32> to vector<64x64xf32>
    %cst_70 = arith.constant dense<0.000000e+00> : vector<8x64xf32>
    %106 = tpu.matmul %103, %105, %cst_70 {dimension_numbers = #tpu.dot_dimension_numbers<[1], [0], [0], [1], [0, 0, 1, 1], [], []>} : vector<8x64xf32>, vector<64x64xf32>, vector<8x64xf32> -> vector<8x64xf32>
    %c1_71 = arith.constant 1 : index
    %c0_72 = arith.constant 0 : index
    %c0_73 = arith.constant 0 : index
    %107 = vector.load %arg3[%c1_71, %c0_72, %c0_73] : memref<9x64x64xf32, #tpu.memory_space<vmem>>, vector<1x64x64xf32>
    %108 = vector.shape_cast %107 : vector<1x64x64xf32> to vector<64x64xf32>
    %cst_74 = arith.constant dense<0.000000e+00> : vector<8x64xf32>
    %109 = tpu.matmul %103, %108, %cst_74 {dimension_numbers = #tpu.dot_dimension_numbers<[1], [0], [0], [1], [0, 0, 1, 1], [], []>} : vector<8x64xf32>, vector<64x64xf32>, vector<8x64xf32> -> vector<8x64xf32>
    %c2_75 = arith.constant 2 : index
    %c0_76 = arith.constant 0 : index
    %c0_77 = arith.constant 0 : index
    %110 = vector.load %arg3[%c2_75, %c0_76, %c0_77] : memref<9x64x64xf32, #tpu.memory_space<vmem>>, vector<1x64x64xf32>
    %111 = vector.shape_cast %110 : vector<1x64x64xf32> to vector<64x64xf32>
    %cst_78 = arith.constant dense<0.000000e+00> : vector<8x64xf32>
    %112 = tpu.matmul %103, %111, %cst_78 {dimension_numbers = #tpu.dot_dimension_numbers<[1], [0], [0], [1], [0, 0, 1, 1], [], []>} : vector<8x64xf32>, vector<64x64xf32>, vector<8x64xf32> -> vector<8x64xf32>
    %c3_79 = arith.constant 3 : index
    %c0_80 = arith.constant 0 : index
    %c0_81 = arith.constant 0 : index
    %113 = vector.load %arg3[%c3_79, %c0_80, %c0_81] : memref<9x64x64xf32, #tpu.memory_space<vmem>>, vector<1x64x64xf32>
    %114 = vector.shape_cast %113 : vector<1x64x64xf32> to vector<64x64xf32>
    %cst_82 = arith.constant dense<0.000000e+00> : vector<8x64xf32>
    %115 = tpu.matmul %103, %114, %cst_82 {dimension_numbers = #tpu.dot_dimension_numbers<[1], [0], [0], [1], [0, 0, 1, 1], [], []>} : vector<8x64xf32>, vector<64x64xf32>, vector<8x64xf32> -> vector<8x64xf32>
    %c4 = arith.constant 4 : index
    %c0_83 = arith.constant 0 : index
    %c0_84 = arith.constant 0 : index
    %116 = vector.load %arg3[%c4, %c0_83, %c0_84] : memref<9x64x64xf32, #tpu.memory_space<vmem>>, vector<1x64x64xf32>
    %117 = vector.shape_cast %116 : vector<1x64x64xf32> to vector<64x64xf32>
    %cst_85 = arith.constant dense<0.000000e+00> : vector<8x64xf32>
    %118 = tpu.matmul %103, %117, %cst_85 {dimension_numbers = #tpu.dot_dimension_numbers<[1], [0], [0], [1], [0, 0, 1, 1], [], []>} : vector<8x64xf32>, vector<64x64xf32>, vector<8x64xf32> -> vector<8x64xf32>
    %c5_86 = arith.constant 5 : index
    %c0_87 = arith.constant 0 : index
    %c0_88 = arith.constant 0 : index
    %119 = vector.load %arg3[%c5_86, %c0_87, %c0_88] : memref<9x64x64xf32, #tpu.memory_space<vmem>>, vector<1x64x64xf32>
    %120 = vector.shape_cast %119 : vector<1x64x64xf32> to vector<64x64xf32>
    %cst_89 = arith.constant dense<0.000000e+00> : vector<8x64xf32>
    %121 = tpu.matmul %103, %120, %cst_89 {dimension_numbers = #tpu.dot_dimension_numbers<[1], [0], [0], [1], [0, 0, 1, 1], [], []>} : vector<8x64xf32>, vector<64x64xf32>, vector<8x64xf32> -> vector<8x64xf32>
    %c6_90 = arith.constant 6 : index
    %c0_91 = arith.constant 0 : index
    %c0_92 = arith.constant 0 : index
    %122 = vector.load %arg3[%c6_90, %c0_91, %c0_92] : memref<9x64x64xf32, #tpu.memory_space<vmem>>, vector<1x64x64xf32>
    %123 = vector.shape_cast %122 : vector<1x64x64xf32> to vector<64x64xf32>
    %cst_93 = arith.constant dense<0.000000e+00> : vector<8x64xf32>
    %124 = tpu.matmul %103, %123, %cst_93 {dimension_numbers = #tpu.dot_dimension_numbers<[1], [0], [0], [1], [0, 0, 1, 1], [], []>} : vector<8x64xf32>, vector<64x64xf32>, vector<8x64xf32> -> vector<8x64xf32>
    %c7_94 = arith.constant 7 : index
    %c0_95 = arith.constant 0 : index
    %c0_96 = arith.constant 0 : index
    %125 = vector.load %arg3[%c7_94, %c0_95, %c0_96] : memref<9x64x64xf32, #tpu.memory_space<vmem>>, vector<1x64x64xf32>
    %126 = vector.shape_cast %125 : vector<1x64x64xf32> to vector<64x64xf32>
    %cst_97 = arith.constant dense<0.000000e+00> : vector<8x64xf32>
    %127 = tpu.matmul %103, %126, %cst_97 {dimension_numbers = #tpu.dot_dimension_numbers<[1], [0], [0], [1], [0, 0, 1, 1], [], []>} : vector<8x64xf32>, vector<64x64xf32>, vector<8x64xf32> -> vector<8x64xf32>
    %c8_98 = arith.constant 8 : index
    %c0_99 = arith.constant 0 : index
    %c0_100 = arith.constant 0 : index
    %128 = vector.load %arg3[%c8_98, %c0_99, %c0_100] : memref<9x64x64xf32, #tpu.memory_space<vmem>>, vector<1x64x64xf32>
    %129 = vector.shape_cast %128 : vector<1x64x64xf32> to vector<64x64xf32>
    %cst_101 = arith.constant dense<0.000000e+00> : vector<8x64xf32>
    %130 = tpu.matmul %103, %129, %cst_101 {dimension_numbers = #tpu.dot_dimension_numbers<[1], [0], [0], [1], [0, 0, 1, 1], [], []>} : vector<8x64xf32>, vector<64x64xf32>, vector<8x64xf32> -> vector<8x64xf32>
    %131 = tpu.concatenate %106, %109, %112, %115, %118, %121, %124, %127, %130 in 0 : vector<8x64xf32>, vector<8x64xf32>, vector<8x64xf32>, vector<8x64xf32>, vector<8x64xf32>, vector<8x64xf32>, vector<8x64xf32>, vector<8x64xf32>, vector<8x64xf32> -> vector<72x64xf32>
    %c0_102 = arith.constant 0 : index
    %c0_103 = arith.constant 0 : index
    %132 = vector.load %arg10[%c0_102, %c0_103] : memref<16x72xf32, #tpu.memory_space<vmem>>, vector<16x72xf32>
    %cst_104 = arith.constant dense<0.000000e+00> : vector<16x64xf32>
    %133 = tpu.matmul %132, %131, %cst_104 {dimension_numbers = #tpu.dot_dimension_numbers<[1], [0], [0], [1], [0, 0, 1, 1], [], []>} : vector<16x72xf32>, vector<72x64xf32>, vector<16x64xf32> -> vector<16x64xf32>
    %c0_105 = arith.constant 0 : index
    %c0_106 = arith.constant 0 : index
    %134 = vector.load %arg11[%c0_105, %c0_106] : memref<16x1xf32, #tpu.memory_space<vmem>>, vector<16x1xf32>
    %135 = vector.broadcast %134 : vector<16x1xf32> to vector<16x64xf32>
    %136 = arith.addf %133, %135 : vector<16x64xf32>
    %cst_107 = arith.constant 0.000000e+00 : f32
    %137 = vector.broadcast %cst_107 : f32 to vector<16x64xf32>
    %138 = arith.maximumf %136, %137 : vector<16x64xf32>
    %c0_108 = arith.constant 0 : index
    %c0_109 = arith.constant 0 : index
    %c0_110 = arith.constant 0 : index
    %139 = vector.load %arg3[%c0_108, %c0_109, %c0_110] : memref<9x64x64xf32, #tpu.memory_space<vmem>>, vector<1x64x64xf32>
    %140 = vector.shape_cast %139 : vector<1x64x64xf32> to vector<64x64xf32>
    %cst_111 = arith.constant dense<0.000000e+00> : vector<16x64xf32>
    %141 = tpu.matmul %138, %140, %cst_111 {dimension_numbers = #tpu.dot_dimension_numbers<[1], [0], [0], [1], [0, 0, 1, 1], [], []>} : vector<16x64xf32>, vector<64x64xf32>, vector<16x64xf32> -> vector<16x64xf32>
    %c1_112 = arith.constant 1 : index
    %c0_113 = arith.constant 0 : index
    %c0_114 = arith.constant 0 : index
    %142 = vector.load %arg3[%c1_112, %c0_113, %c0_114] : memref<9x64x64xf32, #tpu.memory_space<vmem>>, vector<1x64x64xf32>
    %143 = vector.shape_cast %142 : vector<1x64x64xf32> to vector<64x64xf32>
    %cst_115 = arith.constant dense<0.000000e+00> : vector<16x64xf32>
    %144 = tpu.matmul %138, %143, %cst_115 {dimension_numbers = #tpu.dot_dimension_numbers<[1], [0], [0], [1], [0, 0, 1, 1], [], []>} : vector<16x64xf32>, vector<64x64xf32>, vector<16x64xf32> -> vector<16x64xf32>
    %c2_116 = arith.constant 2 : index
    %c0_117 = arith.constant 0 : index
    %c0_118 = arith.constant 0 : index
    %145 = vector.load %arg3[%c2_116, %c0_117, %c0_118] : memref<9x64x64xf32, #tpu.memory_space<vmem>>, vector<1x64x64xf32>
    %146 = vector.shape_cast %145 : vector<1x64x64xf32> to vector<64x64xf32>
    %cst_119 = arith.constant dense<0.000000e+00> : vector<16x64xf32>
    %147 = tpu.matmul %138, %146, %cst_119 {dimension_numbers = #tpu.dot_dimension_numbers<[1], [0], [0], [1], [0, 0, 1, 1], [], []>} : vector<16x64xf32>, vector<64x64xf32>, vector<16x64xf32> -> vector<16x64xf32>
    %c3_120 = arith.constant 3 : index
    %c0_121 = arith.constant 0 : index
    %c0_122 = arith.constant 0 : index
    %148 = vector.load %arg3[%c3_120, %c0_121, %c0_122] : memref<9x64x64xf32, #tpu.memory_space<vmem>>, vector<1x64x64xf32>
    %149 = vector.shape_cast %148 : vector<1x64x64xf32> to vector<64x64xf32>
    %cst_123 = arith.constant dense<0.000000e+00> : vector<16x64xf32>
    %150 = tpu.matmul %138, %149, %cst_123 {dimension_numbers = #tpu.dot_dimension_numbers<[1], [0], [0], [1], [0, 0, 1, 1], [], []>} : vector<16x64xf32>, vector<64x64xf32>, vector<16x64xf32> -> vector<16x64xf32>
    %c4_124 = arith.constant 4 : index
    %c0_125 = arith.constant 0 : index
    %c0_126 = arith.constant 0 : index
    %151 = vector.load %arg3[%c4_124, %c0_125, %c0_126] : memref<9x64x64xf32, #tpu.memory_space<vmem>>, vector<1x64x64xf32>
    %152 = vector.shape_cast %151 : vector<1x64x64xf32> to vector<64x64xf32>
    %cst_127 = arith.constant dense<0.000000e+00> : vector<16x64xf32>
    %153 = tpu.matmul %138, %152, %cst_127 {dimension_numbers = #tpu.dot_dimension_numbers<[1], [0], [0], [1], [0, 0, 1, 1], [], []>} : vector<16x64xf32>, vector<64x64xf32>, vector<16x64xf32> -> vector<16x64xf32>
    %c5_128 = arith.constant 5 : index
    %c0_129 = arith.constant 0 : index
    %c0_130 = arith.constant 0 : index
    %154 = vector.load %arg3[%c5_128, %c0_129, %c0_130] : memref<9x64x64xf32, #tpu.memory_space<vmem>>, vector<1x64x64xf32>
    %155 = vector.shape_cast %154 : vector<1x64x64xf32> to vector<64x64xf32>
    %cst_131 = arith.constant dense<0.000000e+00> : vector<16x64xf32>
    %156 = tpu.matmul %138, %155, %cst_131 {dimension_numbers = #tpu.dot_dimension_numbers<[1], [0], [0], [1], [0, 0, 1, 1], [], []>} : vector<16x64xf32>, vector<64x64xf32>, vector<16x64xf32> -> vector<16x64xf32>
    %c6_132 = arith.constant 6 : index
    %c0_133 = arith.constant 0 : index
    %c0_134 = arith.constant 0 : index
    %157 = vector.load %arg3[%c6_132, %c0_133, %c0_134] : memref<9x64x64xf32, #tpu.memory_space<vmem>>, vector<1x64x64xf32>
    %158 = vector.shape_cast %157 : vector<1x64x64xf32> to vector<64x64xf32>
    %cst_135 = arith.constant dense<0.000000e+00> : vector<16x64xf32>
    %159 = tpu.matmul %138, %158, %cst_135 {dimension_numbers = #tpu.dot_dimension_numbers<[1], [0], [0], [1], [0, 0, 1, 1], [], []>} : vector<16x64xf32>, vector<64x64xf32>, vector<16x64xf32> -> vector<16x64xf32>
    %c7_136 = arith.constant 7 : index
    %c0_137 = arith.constant 0 : index
    %c0_138 = arith.constant 0 : index
    %160 = vector.load %arg3[%c7_136, %c0_137, %c0_138] : memref<9x64x64xf32, #tpu.memory_space<vmem>>, vector<1x64x64xf32>
    %161 = vector.shape_cast %160 : vector<1x64x64xf32> to vector<64x64xf32>
    %cst_139 = arith.constant dense<0.000000e+00> : vector<16x64xf32>
    %162 = tpu.matmul %138, %161, %cst_139 {dimension_numbers = #tpu.dot_dimension_numbers<[1], [0], [0], [1], [0, 0, 1, 1], [], []>} : vector<16x64xf32>, vector<64x64xf32>, vector<16x64xf32> -> vector<16x64xf32>
    %c8_140 = arith.constant 8 : index
    %c0_141 = arith.constant 0 : index
    %c0_142 = arith.constant 0 : index
    %163 = vector.load %arg3[%c8_140, %c0_141, %c0_142] : memref<9x64x64xf32, #tpu.memory_space<vmem>>, vector<1x64x64xf32>
    %164 = vector.shape_cast %163 : vector<1x64x64xf32> to vector<64x64xf32>
    %cst_143 = arith.constant dense<0.000000e+00> : vector<16x64xf32>
    %165 = tpu.matmul %138, %164, %cst_143 {dimension_numbers = #tpu.dot_dimension_numbers<[1], [0], [0], [1], [0, 0, 1, 1], [], []>} : vector<16x64xf32>, vector<64x64xf32>, vector<16x64xf32> -> vector<16x64xf32>
    %166 = tpu.concatenate %141, %144, %147, %150, %153, %156, %159, %162, %165 in 0 : vector<16x64xf32>, vector<16x64xf32>, vector<16x64xf32>, vector<16x64xf32>, vector<16x64xf32>, vector<16x64xf32>, vector<16x64xf32>, vector<16x64xf32>, vector<16x64xf32> -> vector<144x64xf32>
    %c0_144 = arith.constant 0 : index
    %c0_145 = arith.constant 0 : index
    %167 = vector.load %arg12[%c0_144, %c0_145] : memref<16x144xf32, #tpu.memory_space<vmem>>, vector<16x144xf32>
    %cst_146 = arith.constant dense<0.000000e+00> : vector<16x64xf32>
    %168 = tpu.matmul %167, %166, %cst_146 {dimension_numbers = #tpu.dot_dimension_numbers<[1], [0], [0], [1], [0, 0, 1, 1], [], []>} : vector<16x144xf32>, vector<144x64xf32>, vector<16x64xf32> -> vector<16x64xf32>
    %c0_147 = arith.constant 0 : index
    %c0_148 = arith.constant 0 : index
    %169 = vector.load %arg13[%c0_147, %c0_148] : memref<16x1xf32, #tpu.memory_space<vmem>>, vector<16x1xf32>
    %170 = vector.broadcast %169 : vector<16x1xf32> to vector<16x64xf32>
    %171 = arith.addf %168, %170 : vector<16x64xf32>
    %cst_149 = arith.constant 0.000000e+00 : f32
    %172 = vector.broadcast %cst_149 : f32 to vector<16x64xf32>
    %173 = arith.maximumf %171, %172 : vector<16x64xf32>
    %c0_150 = arith.constant 0 : index
    %c0_151 = arith.constant 0 : index
    %174 = vector.load %arg5[%c0_150, %c0_151] : memref<64x256xf32, #tpu.memory_space<vmem>>, vector<64x256xf32>
    %cst_152 = arith.constant dense<0.000000e+00> : vector<16x256xf32>
    %175 = tpu.matmul %173, %174, %cst_152 {dimension_numbers = #tpu.dot_dimension_numbers<[1], [0], [0], [1], [0, 0, 1, 1], [], []>} : vector<16x64xf32>, vector<64x256xf32>, vector<16x256xf32> -> vector<16x256xf32>
    %176 = tpu.concatenate %175, %97 in 0 : vector<16x256xf32>, vector<8x256xf32> -> vector<24x256xf32>
    %c17_i32_153 = arith.constant 17 : i32
    %177 = tpu.dynamic_rotate %176 by %c17_i32_153 dim 1 : vector<24x256xf32>, i32 -> vector<24x256xf32>
    %c0_154 = arith.constant 0 : index
    %c0_155 = arith.constant 0 : index
    %c0_156 = arith.constant 0 : index
    %178 = vector.load %arg2[%c0_154, %c0_155, %c0_156] : memref<9x1x256xf32, #tpu.memory_space<vmem>>, vector<1x1x256xf32>
    %179 = vector.shape_cast %178 : vector<1x1x256xf32> to vector<1x256xf32>
    %180 = vector.broadcast %179 : vector<1x256xf32> to vector<24x256xf32>
    %181 = arith.mulf %177, %180 : vector<24x256xf32>
    %c16_i32_157 = arith.constant 16 : i32
    %182 = tpu.dynamic_rotate %176 by %c16_i32_157 dim 1 : vector<24x256xf32>, i32 -> vector<24x256xf32>
    %c1_158 = arith.constant 1 : index
    %c0_159 = arith.constant 0 : index
    %c0_160 = arith.constant 0 : index
    %183 = vector.load %arg2[%c1_158, %c0_159, %c0_160] : memref<9x1x256xf32, #tpu.memory_space<vmem>>, vector<1x1x256xf32>
    %184 = vector.shape_cast %183 : vector<1x1x256xf32> to vector<1x256xf32>
    %185 = vector.broadcast %184 : vector<1x256xf32> to vector<24x256xf32>
    %186 = arith.mulf %182, %185 : vector<24x256xf32>
    %c15_i32_161 = arith.constant 15 : i32
    %187 = tpu.dynamic_rotate %176 by %c15_i32_161 dim 1 : vector<24x256xf32>, i32 -> vector<24x256xf32>
    %c2_162 = arith.constant 2 : index
    %c0_163 = arith.constant 0 : index
    %c0_164 = arith.constant 0 : index
    %188 = vector.load %arg2[%c2_162, %c0_163, %c0_164] : memref<9x1x256xf32, #tpu.memory_space<vmem>>, vector<1x1x256xf32>
    %189 = vector.shape_cast %188 : vector<1x1x256xf32> to vector<1x256xf32>
    %190 = vector.broadcast %189 : vector<1x256xf32> to vector<24x256xf32>
    %191 = arith.mulf %187, %190 : vector<24x256xf32>
    %c1_i32_165 = arith.constant 1 : i32
    %192 = tpu.dynamic_rotate %176 by %c1_i32_165 dim 1 : vector<24x256xf32>, i32 -> vector<24x256xf32>
    %c3_166 = arith.constant 3 : index
    %c0_167 = arith.constant 0 : index
    %c0_168 = arith.constant 0 : index
    %193 = vector.load %arg2[%c3_166, %c0_167, %c0_168] : memref<9x1x256xf32, #tpu.memory_space<vmem>>, vector<1x1x256xf32>
    %194 = vector.shape_cast %193 : vector<1x1x256xf32> to vector<1x256xf32>
    %195 = vector.broadcast %194 : vector<1x256xf32> to vector<24x256xf32>
    %196 = arith.mulf %192, %195 : vector<24x256xf32>
    %c255_i32_169 = arith.constant 255 : i32
    %197 = tpu.dynamic_rotate %176 by %c255_i32_169 dim 1 : vector<24x256xf32>, i32 -> vector<24x256xf32>
    %c5_170 = arith.constant 5 : index
    %c0_171 = arith.constant 0 : index
    %c0_172 = arith.constant 0 : index
    %198 = vector.load %arg2[%c5_170, %c0_171, %c0_172] : memref<9x1x256xf32, #tpu.memory_space<vmem>>, vector<1x1x256xf32>
    %199 = vector.shape_cast %198 : vector<1x1x256xf32> to vector<1x256xf32>
    %200 = vector.broadcast %199 : vector<1x256xf32> to vector<24x256xf32>
    %201 = arith.mulf %197, %200 : vector<24x256xf32>
    %c241_i32_173 = arith.constant 241 : i32
    %202 = tpu.dynamic_rotate %176 by %c241_i32_173 dim 1 : vector<24x256xf32>, i32 -> vector<24x256xf32>
    %c6_174 = arith.constant 6 : index
    %c0_175 = arith.constant 0 : index
    %c0_176 = arith.constant 0 : index
    %203 = vector.load %arg2[%c6_174, %c0_175, %c0_176] : memref<9x1x256xf32, #tpu.memory_space<vmem>>, vector<1x1x256xf32>
    %204 = vector.shape_cast %203 : vector<1x1x256xf32> to vector<1x256xf32>
    %205 = vector.broadcast %204 : vector<1x256xf32> to vector<24x256xf32>
    %206 = arith.mulf %202, %205 : vector<24x256xf32>
    %c240_i32_177 = arith.constant 240 : i32
    %207 = tpu.dynamic_rotate %176 by %c240_i32_177 dim 1 : vector<24x256xf32>, i32 -> vector<24x256xf32>
    %c7_178 = arith.constant 7 : index
    %c0_179 = arith.constant 0 : index
    %c0_180 = arith.constant 0 : index
    %208 = vector.load %arg2[%c7_178, %c0_179, %c0_180] : memref<9x1x256xf32, #tpu.memory_space<vmem>>, vector<1x1x256xf32>
    %209 = vector.shape_cast %208 : vector<1x1x256xf32> to vector<1x256xf32>
    %210 = vector.broadcast %209 : vector<1x256xf32> to vector<24x256xf32>
    %211 = arith.mulf %207, %210 : vector<24x256xf32>
    %c239_i32_181 = arith.constant 239 : i32
    %212 = tpu.dynamic_rotate %176 by %c239_i32_181 dim 1 : vector<24x256xf32>, i32 -> vector<24x256xf32>
    %c8_182 = arith.constant 8 : index
    %c0_183 = arith.constant 0 : index
    %c0_184 = arith.constant 0 : index
    %213 = vector.load %arg2[%c8_182, %c0_183, %c0_184] : memref<9x1x256xf32, #tpu.memory_space<vmem>>, vector<1x1x256xf32>
    %214 = vector.shape_cast %213 : vector<1x1x256xf32> to vector<1x256xf32>
    %215 = vector.broadcast %214 : vector<1x256xf32> to vector<24x256xf32>
    %216 = arith.mulf %212, %215 : vector<24x256xf32>
    %217 = tpu.concatenate %181, %186, %191, %196, %176, %201, %206, %211, %216 in 0 : vector<24x256xf32>, vector<24x256xf32>, vector<24x256xf32>, vector<24x256xf32>, vector<24x256xf32>, vector<24x256xf32>, vector<24x256xf32>, vector<24x256xf32>, vector<24x256xf32> -> vector<216x256xf32>
    %c0_185 = arith.constant 0 : index
    %c0_186 = arith.constant 0 : index
    %218 = vector.load %arg14[%c0_185, %c0_186] : memref<8x216xf32, #tpu.memory_space<vmem>>, vector<8x216xf32>
    %cst_187 = arith.constant dense<0.000000e+00> : vector<8x256xf32>
    %219 = tpu.matmul %218, %217, %cst_187 {dimension_numbers = #tpu.dot_dimension_numbers<[1], [0], [0], [1], [0, 0, 1, 1], [], []>} : vector<8x216xf32>, vector<216x256xf32>, vector<8x256xf32> -> vector<8x256xf32>
    %c0_188 = arith.constant 0 : index
    %c0_189 = arith.constant 0 : index
    %220 = vector.load %arg15[%c0_188, %c0_189] : memref<8x1xf32, #tpu.memory_space<vmem>>, vector<8x1xf32>
    %221 = vector.broadcast %220 : vector<8x1xf32> to vector<8x256xf32>
    %222 = arith.addf %219, %221 : vector<8x256xf32>
    %cst_190 = arith.constant 0.000000e+00 : f32
    %223 = vector.broadcast %cst_190 : f32 to vector<8x256xf32>
    %224 = arith.maximumf %222, %223 : vector<8x256xf32>
    %c0_191 = arith.constant 0 : index
    %c0_192 = arith.constant 0 : index
    %225 = vector.load %arg16[%c0_191, %c0_192] : memref<3x8xf32, #tpu.memory_space<vmem>>, vector<3x8xf32>
    %cst_193 = arith.constant dense<0.000000e+00> : vector<3x256xf32>
    %226 = tpu.matmul %225, %224, %cst_193 {dimension_numbers = #tpu.dot_dimension_numbers<[1], [0], [0], [1], [0, 0, 1, 1], [], []>} : vector<3x8xf32>, vector<8x256xf32>, vector<3x256xf32> -> vector<3x256xf32>
    %c0_194 = arith.constant 0 : index
    %c0_195 = arith.constant 0 : index
    %227 = vector.load %arg17[%c0_194, %c0_195] : memref<3x1xf32, #tpu.memory_space<vmem>>, vector<3x1xf32>
    %228 = vector.broadcast %227 : vector<3x1xf32> to vector<3x256xf32>
    %229 = arith.addf %226, %228 : vector<3x256xf32>
    %c0_196 = arith.constant 0 : index
    %c0_197 = arith.constant 0 : index
    %c0_198 = arith.constant 0 : index
    %230 = vector.load %arg18[%c0_196, %c0_197, %c0_198] : memref<1x3x256xf32, #tpu.memory_space<vmem>>, vector<1x3x256xf32>
    %231 = vector.shape_cast %230 : vector<1x3x256xf32> to vector<3x256xf32>
    %232 = vector.shape_cast %229 : vector<3x256xf32> to vector<1x3x256xf32>
    tpu.vector_store %arg18[%c0_196, %c0_197, %c0_198], %232 {strides = array<i32>} : memref<1x3x256xf32, #tpu.memory_space<vmem>>, vector<1x3x256xf32>,
    return
  }
  func.func @transform_0(%arg0: i32) -> (i32, i32, i32) {
    %c0_i32 = arith.constant 0 : i32
    %c0_i32_0 = arith.constant 0 : i32
    %c0_i32_1 = arith.constant 0 : i32
    return %arg0, %c0_i32, %c0_i32_0 : i32, i32, i32
  }
  func.func @transform_1(%arg0: i32) -> (i32, i32, i32) {
    %c0_i32 = arith.constant 0 : i32
    %c0_i32_0 = arith.constant 0 : i32
    %c0_i32_1 = arith.constant 0 : i32
    %c0_i32_2 = arith.constant 0 : i32
    return %c0_i32, %c0_i32_0, %c0_i32_1 : i32, i32, i32
  }
  func.func @transform_2(%arg0: i32) -> (i32, i32, i32) {
    %c0_i32 = arith.constant 0 : i32
    %c0_i32_0 = arith.constant 0 : i32
    %c0_i32_1 = arith.constant 0 : i32
    %c0_i32_2 = arith.constant 0 : i32
    return %c0_i32, %c0_i32_0, %c0_i32_1 : i32, i32, i32
  }
  func.func @transform_3(%arg0: i32) -> (i32, i32) {
    %c0_i32 = arith.constant 0 : i32
    %c0_i32_0 = arith.constant 0 : i32
    %c0_i32_1 = arith.constant 0 : i32
    return %c0_i32, %c0_i32_0 : i32, i32
  }
  func.func @transform_4(%arg0: i32) -> (i32, i32) {
    %c0_i32 = arith.constant 0 : i32
    %c0_i32_0 = arith.constant 0 : i32
    %c0_i32_1 = arith.constant 0 : i32
    return %c0_i32, %c0_i32_0 : i32, i32
  }
  func.func @transform_5(%arg0: i32) -> (i32, i32) {
    %c0_i32 = arith.constant 0 : i32
    %c0_i32_0 = arith.constant 0 : i32
    %c0_i32_1 = arith.constant 0 : i32
    return %c0_i32, %c0_i32_0 : i32, i32
  }
  func.func @transform_6(%arg0: i32) -> (i32, i32) {
    %c0_i32 = arith.constant 0 : i32
    %c0_i32_0 = arith.constant 0 : i32
    %c0_i32_1 = arith.constant 0 : i32
    return %c0_i32, %c0_i32_0 : i32, i32
  }
  func.func @transform_7(%arg0: i32) -> (i32, i32) {
    %c0_i32 = arith.constant 0 : i32
    %c0_i32_0 = arith.constant 0 : i32
    %c0_i32_1 = arith.constant 0 : i32
    return %c0_i32, %c0_i32_0 : i32, i32
  }
  func.func @transform_8(%arg0: i32) -> (i32, i32) {
    %c0_i32 = arith.constant 0 : i32
    %c0_i32_0 = arith.constant 0 : i32
    %c0_i32_1 = arith.constant 0 : i32
    return %c0_i32, %c0_i32_0 : i32, i32
  }
  func.func @transform_9(%arg0: i32) -> (i32, i32) {
    %c0_i32 = arith.constant 0 : i32
    %c0_i32_0 = arith.constant 0 : i32
    %c0_i32_1 = arith.constant 0 : i32
    return %c0_i32, %c0_i32_0 : i32, i32
  }
  func.func @transform_10(%arg0: i32) -> (i32, i32) {
    %c0_i32 = arith.constant 0 : i32
    %c0_i32_0 = arith.constant 0 : i32
    %c0_i32_1 = arith.constant 0 : i32
    return %c0_i32, %c0_i32_0 : i32, i32
  }
  func.func @transform_11(%arg0: i32) -> (i32, i32) {
    %c0_i32 = arith.constant 0 : i32
    %c0_i32_0 = arith.constant 0 : i32
    %c0_i32_1 = arith.constant 0 : i32
    return %c0_i32, %c0_i32_0 : i32, i32
  }
  func.func @transform_12(%arg0: i32) -> (i32, i32) {
    %c0_i32 = arith.constant 0 : i32
    %c0_i32_0 = arith.constant 0 : i32
    %c0_i32_1 = arith.constant 0 : i32
    return %c0_i32, %c0_i32_0 : i32, i32
  }
  func.func @transform_13(%arg0: i32) -> (i32, i32) {
    %c0_i32 = arith.constant 0 : i32
    %c0_i32_0 = arith.constant 0 : i32
    %c0_i32_1 = arith.constant 0 : i32
    return %c0_i32, %c0_i32_0 : i32, i32
  }
  func.func @transform_14(%arg0: i32) -> (i32, i32) {
    %c0_i32 = arith.constant 0 : i32
    %c0_i32_0 = arith.constant 0 : i32
    %c0_i32_1 = arith.constant 0 : i32
    return %c0_i32, %c0_i32_0 : i32, i32
  }
  func.func @transform_15(%arg0: i32) -> (i32, i32) {
    %c0_i32 = arith.constant 0 : i32
    %c0_i32_0 = arith.constant 0 : i32
    %c0_i32_1 = arith.constant 0 : i32
    return %c0_i32, %c0_i32_0 : i32, i32
  }
  func.func @transform_16(%arg0: i32) -> (i32, i32) {
    %c0_i32 = arith.constant 0 : i32
    %c0_i32_0 = arith.constant 0 : i32
    %c0_i32_1 = arith.constant 0 : i32
    return %c0_i32, %c0_i32_0 : i32, i32
  }
  func.func @transform_17(%arg0: i32) -> (i32, i32, i32) {
    %c0_i32 = arith.constant 0 : i32
    %c0_i32_0 = arith.constant 0 : i32
    %c0_i32_1 = arith.constant 0 : i32
    return %arg0, %c0_i32, %c0_i32_0 : i32, i32, i32
  }
}

</mosaic_0001>

<bundles_post_ra>
// kernel: tpu_custom_call.1
= control target key start
LH: loop header
LB: loop body
LE: loop exit
PB: predicated region body
PF: predicated region fallthrough
CT: control target
= control target key end

     0   :  { %s3340_s0 = inlined_call_operand.vmem [shape: f32[2,8,256], index: 0, kind: input, shape index: {}]   ;;  %s3341_s1 = inlined_call_operand.vmem [shape: f32[9,1,256], index: 1, kind: input, shape index: {}]   ;;  %s3342_s2 = inlined_call_operand.hbm [shape: f32[9,64,64], index: 2, kind: input, shape index: {}]   ;;  %s3343_s3 = inlined_call_operand.vmem [shape: f32[256,64], index: 3, kind: input, shape index: {}]   ;;  %s3344_s4 = inlined_call_operand.vmem [shape: f32[64,256], index: 4, kind: input, shape index: {}]   ;;  %s3345_s5 = inlined_call_operand.vmem [shape: f32[8,72], index: 5, kind: input, shape index: {}]   ;;  %s3346_s6 = inlined_call_operand.vmem [shape: f32[8,1], index: 6, kind: input, shape index: {}]   ;;  %s3347_s7 = inlined_call_operand.vmem [shape: f32[8,72], index: 7, kind: input, shape index: {}]   ;;  %s3348_s8 = inlined_call_operand.vmem [shape: f32[8,1], index: 8, kind: input, shape index: {}]   ;;  %s3349_s9 = inlined_call_operand.vmem [shape: f32[16,72], index: 9, kind: input, shape index: {}]   ;;  %s3350_s10 = inlined_call_operand.vmem [shape: f32[16,1], index: 10, kind: input, shape index: {}]   ;;  %s3351_s11 = inlined_call_operand.vmem [shape: f32[16,144], index: 11, kind: input, shape index: {}]   ;;  %s3352_s12 = inlined_call_operand.vmem [shape: f32[16,1], index: 12, kind: input, shape index: {}]   ;;  %s3353_s13 = inlined_call_operand.vmem [shape: f32[8,216], index: 13, kind: input, shape index: {}]   ;;  %s3354_s14 = inlined_call_operand.vmem [shape: f32[8,1], index: 14, kind: input, shape index: {}]   ;;  %s3355_s15 = inlined_call_operand.vmem [shape: f32[3,8], index: 15, kind: input, shape index: {}]   ;;  %s3356_s16 = inlined_call_operand.vmem [shape: f32[3,1], index: 16, kind: input, shape index: {}]   ;;  %s3357_s17 = inlined_call_operand.vmem [shape: f32[2,3,256], index: 17, kind: output, shape index: {}]  }
   0x1   :  { %3425 = sst [smem:[#allocation43_spill]] %s3340_s0 }
   0x2   :  { %3426 = sst [smem:[#allocation44_spill]] %s3341_s1 }
   0x3   :  { %3427 = sst [smem:[#allocation45_spill]] %s3342_s2 }
   0x4   :  { %3428 = sst [smem:[#allocation46_spill]] %s3345_s5 }
   0x5   :  { %3429 = sst [smem:[#allocation47_spill]] %s3346_s6 }
   0x6   :  { %22 = vsyncpa [#allocation3], 0  ;;  %s2267_s24 = smov 0  }
   0x7 LB: > { %s3430_s2 = sld [smem:[#allocation45_spill]]  ;;  %s2020_s28 = sadd.s32 4294967295, %s2163_s24   ;;  %s2163_s24 = sphi %s2267_s24, %s28_s24  }
   0x8   : > { %p2022_p0 = scmp.ge.s32.totalorder %s2163_s24, 1  ;;  %p421_p1 = scmp.lt.s32.totalorder %s2163_s24, 3 }
   0x9   : > { %p2093_p2 = scmp.eq.s32.totalorder %s2020_s28, 0  ;;  %s2165_s29 = smov [#allocation2]  }
   0xa   : > { %p422_p3 = pnand %p2022_p0, %p421_p1  ;;  %s437_s0 = sshll.u32 %s2165_s29, 4  ;;  %s438_s0 = int_to_ptr.vmem [resolvable:$true] %s437_s0 }
   0xb   : > { %s2166_s30 = smov 128   ;;  %s2167_s18 = smov 8  }
   0xc   : > { %p2089_p4 = pneg %p422_p3  ;;  %503 = sbr.rel (%p422_p3) target bundleno = 2218 (0x8aa), region = 88 }
   0xd   : > { %s435_s27 = sshll.u32 %s3430_s2, 4  ;;  %s436_s27 = int_to_ptr.hbm [resolvable:$true] %s435_s27 }
   0xe   : > { %p2090_p5 = pnand %p2093_p2, %p2089_p4 }
  0x10   : > { %2092 = dma.hbm_to_vmem [thread:$0]  (!%p2090_p5), %s436_s27, 9216, %s438_s0, [#allocation3], %s2166_s30, %s2166_s30, %s2167_s18  }
  0x11   : > { %2158 = dma.done.wait (%p2093_p2), [#allocation3], 9216  }
  0x12   : > { %2160 = vsyncadd (%p2093_p2), [#allocation3], 4294958080  ;;  %p556_p6 = scmp.lt.s32.totalorder %s2020_s28, 1  ;;  %s3431_s21 = sld [smem:[#allocation43_spill]]  ;;  %v572_v3 = vlaneseq  ;;  %v2176_v36 = vmov 0   ;;  %vm704_vm8 = vcmask 588800  }
  0x13   : > { %s3371_s23 = smov 112   ;;  %s3373_s25 = smov 111   ;;  %2115 = vset.pattern.permute.xlu1 %v2176_v36  ;;  %2116 = vset.pattern.permute.xlu0 %v2176_v36  ;;  %vm962_vm9 = vcmask 523264   ;;  %vm1492_vm10 = vcmask 130048   ;;  %vm1809_vm11 = vcmask 719872   ;;  %vm1902_vm12 = vcmask 64512  }
  0x14   : > { %s3520_s28 = smov (!%p556_p6, %s2020_s28), 1  ;;  %s3369_s26 = smov 113   ;;  %v2320_v6 = vand.u32 127, %v572_v3  ;;  %2122 = vset.pattern.permute.xlu2 %v2176_v36  ;;  %vm1949_vm13 = vcmask 1043456  }
  0x15   : > { %s2083_s19 = sshll.u32 %s3520_s28, 4  ;;  %s3365_s27 = smov 127  }
  0x16   : > { %s3367_s29 = smov 1   ;;  %s3363_s0 = smov 15   ;;  %3432 = vst [vmem:[#allocation5_spill] sm:$0xff] %v2320_v6  ;;  %vm669_vm0 = vcmp.lt.s32.totalorder %v2320_v6, 112  ;;  %vm685_vm1 = vcmp.lt.s32.totalorder %v2320_v6, 111  ;;  %vm653_vm2 = vcmp.lt.s32.totalorder %v2320_v6, 113 }
  0x17   : > { %s3359_s30 = smov 16   ;;  %s3361_s18 = smov 17   ;;  %vm637_vm3 = vcmp.lt.s32.totalorder %v2320_v6, 127  ;;  %vm621_vm4 = vcmp.lt.s32.totalorder %v2320_v6, 1  ;;  %vm605_vm5 = vcmp.lt.s32.totalorder %v2320_v6, 15  ;;  %vm589_vm6 = vcmp.lt.s32.totalorder %v2320_v6, 16 }
  0x18   : > { %s560_s22 = scalar_lea.vmem %s3431_s21, %s2083_s19  ;;  %s3433_s20 = sld [smem:[#allocation44_spill]]  ;;  %vm574_vm7 = vcmp.lt.s32.totalorder %v2320_v6, 17  ;;  %v2883_v6 = vld [vmem:[#allocation2 + $0x1f8] sm:$0xff] }
  0x19   : > { %v2284_v0 = vld [vmem:[%s560_s22] sm:$0xff]  ;;  %v2292_v1 = vld [vmem:[%s560_s22 + $0x8] sm:$0xff]  ;;  %s3442_s6 = sld [smem:[#allocation47_spill]]  ;;  %s3452_s19 = smov 17  }
  0x1a   : > { %665 = vrot.lane.b32.xlu1 %v2284_v0, %s3371_s23  ;;  %681 = vrot.lane.b32.xlu0 %v2284_v0, %s3373_s25  ;;  %s3451_s5 = sld [smem:[#allocation46_spill]]  ;;  %s3453_s1 = smov 16  }
  0x1b   : > { %649 = vrot.lane.b32.xlu2 %v2284_v0, %s3369_s26  ;;  %s3466_s22 = smov 112  }
  0x1e   : > { %v2037_v7 = vld [vmem:[%s3433_s20 + $0x10] sm:$0x3]  ;;  %v2036_v9 = vld [vmem:[%s3433_s20 + $0xe] sm:$0x3]  ;;  %v2035_v12 = vld [vmem:[%s3433_s20 + $0xc] sm:$0x3] }
  0x1f   : > { %v2330_v10 = vperm.slane %v2037_v7, 0  ;;  %v2332_v11 = vperm.slane %v2037_v7, 1  ;;  %v2338_v15 = vperm.slane %v2036_v9, 0  ;;  %v2340_v16 = vperm.slane %v2036_v9, 1  ;;  %v2034_v27 = vld [vmem:[%s3433_s20 + $0xa] sm:$0x3] }
  0x20   : > { %v2352_v23 = vperm.slane %v2035_v12, 0  ;;  %v2354_v24 = vperm.slane %v2035_v12, 1  ;;  %v2368_v33 = vperm.slane %v2034_v27, 0  ;;  %v2370_v34 = vperm.slane %v2034_v27, 1  ;;  %v698_v35 = vld [vmem:[%s3442_s6] sm:$0xff] }
  0x21   : > { %3434 = vst [vmem:[#allocation6_spill] sm:$0xff] %v2330_v10  ;;  %v2033_v43 = vld [vmem:[%s3433_s20 + $0x6] sm:$0x3]  ;;  %v2032_v44 = vld [vmem:[%s3433_s20 + $0x4] sm:$0x3] }
  0x22   : > { %667 = vrot.lane.b32.xlu1 %v2292_v1, %s3371_s23  ;;  %683 = vrot.lane.b32.xlu0 %v2292_v1, %s3373_s25  ;;  %3435 = vst [vmem:[#allocation7_spill] sm:$0xff] %v2332_v11  ;;  %v2388_v45 = vperm.slane %v2033_v43, 0  ;;  %v2392_v46 = vperm.slane %v2033_v43, 1  ;;  %v2395_v48 = vperm.slane %v2032_v44, 0  ;;  %v2397_v49 = vperm.slane %v2032_v44, 1 }
  0x23   : > { %651 = vrot.lane.b32.xlu2 %v2292_v1, %s3369_s26  ;;  %3436 = vst [vmem:[#allocation8_spill] sm:$0xff] %v2338_v15  ;;  %v2031_v60 = vld [vmem:[%s3433_s20 + $0x2] sm:$0x3] }
  0x24   : > { %3437 = vst [vmem:[#allocation9_spill] sm:$0xff] %v2340_v16  ;;  %v2415_v61 = vperm.slane %v2031_v60, 0  ;;  %v2417_v62 = vperm.slane %v2031_v60, 1 }
  0x25   : > { %3438 = vst [vmem:[#allocation10_spill] sm:$0xff] %v2352_v23 }
  0x26   : > { %3439 = vst [vmem:[#allocation11_spill] sm:$0xff] %v2354_v24 }
  0x27   : > { %3440 = vst [vmem:[#allocation12_spill] sm:$0xff] %v2368_v33 }
  0x28   : > { %3441 = vst [vmem:[#allocation13_spill] sm:$0xff] %v2370_v34 }
  0x29   : > { %3443 = vst [vmem:[#allocation14_spill] sm:$0xff] %v2388_v45 }
  0x2a   : > { %635 = vrot.lane.b32.xlu1 %v2292_v1, %s3365_s27  ;;  %633 = vrot.lane.b32.xlu0 %v2284_v0, %s3365_s27  ;;  %3444 = vst [vmem:[#allocation15_spill] sm:$0xff] %v2392_v46 }
  0x2b   : > { %617 = vrot.lane.b32.xlu2 %v2284_v0, %s3367_s29  ;;  %3445 = vst [vmem:[#allocation16_spill] sm:$0xff] %v2395_v48 }
  0x2c   : > { %3446 = vst [vmem:[#allocation17_spill] sm:$0xff] %v2397_v49 }
  0x2d   : > { %3447 = vst [vmem:[#allocation18_spill] sm:$0xff] %v2415_v61 }
  0x2e   : > { %3448 = vst [vmem:[#allocation19_spill] sm:$0xff] %v2417_v62 }
  0x32   : > { %601 = vrot.lane.b32.xlu1 %v2284_v0, %s3363_s0  ;;  %619 = vrot.lane.b32.xlu0 %v2292_v1, %s3367_s29 }
  0x33   : > { %603 = vrot.lane.b32.xlu2 %v2292_v1, %s3363_s0 }
  0x3a   : > { %587 = vrot.lane.b32.xlu1 %v2292_v1, %s3359_s30  ;;  %585 = vrot.lane.b32.xlu0 %v2284_v0, %s3359_s30  ;;  %s3464_s30 = smov 111  }
  0x3b   : > { %568 = vrot.lane.b32.xlu2 %v2284_v0, %s3361_s18 }
  0x42   : > { %570 = vrot.lane.b32.xlu0 %v2292_v1, %s3361_s18  ;;  %701 = vperm.xlu1 %2115, %v698_v35   ;;  %s2084_s18 = sshll.u32 %s3520_s28, 3 }
  0x75   : > { %v650_v2 = vpop.permute.xlu2 %649 }
  0x7d   : > { %v652_v8 = vpop.permute.xlu2 %651 }
  0x7e   : > { %v654_v25 = vsel %vm653_vm2, %v650_v2, %v652_v8  ;;  %v655_v26 = vsel %vm653_vm2, %v652_v8, %v650_v2 }
  0x7f   : > { %v663_v31 = vmul.f32 %v2352_v23, %v654_v25  ;;  %v664_v32 = vmul.f32 %v2354_v24, %v655_v26 }
  0x85   : > { %v618_v30 = vpop.permute.xlu2 %617 }
  0x8c   : > { %v666_v4 = vpop.permute.xlu1 %665  ;;  %v682_v5 = vpop.permute.xlu0 %681 }
  0x8d   : > { %v604_v47 = vpop.permute.xlu2 %603 }
  0x94   : > { %v668_v13 = vpop.permute.xlu1 %667  ;;  %v684_v14 = vpop.permute.xlu0 %683 }
  0x95   : > { %v670_v17 = vsel %vm669_vm0, %v666_v4, %v668_v13  ;;  %v671_v18 = vsel %vm669_vm0, %v668_v13, %v666_v4  ;;  %v686_v19 = vsel %vm685_vm1, %v682_v5, %v684_v14  ;;  %v687_v20 = vsel %vm685_vm1, %v684_v14, %v682_v5  ;;  %v577_v5 = vld [vmem:[%s3433_s20] sm:$0x3]  ;;  %v569_v7 = vpop.permute.xlu2 %568 }
  0x96   : > { %v695_v21 = vmul.f32 %v2330_v10, %v686_v19  ;;  %v696_v22 = vmul.f32 %v2332_v11, %v687_v20  ;;  %v679_v28 = vmul.f32 %v2338_v15, %v670_v17  ;;  %v680_v29 = vmul.f32 %v2340_v16, %v671_v18  ;;  %v697_v19 = vld [vmem:[%s3451_s5] sm:$0xff]  ;;  %s3493_s5 = smov 15  }
  0x97   : > { %v2429_v8 = vperm.slane %v577_v5, 0  ;;  %v2431_v9 = vperm.slane %v577_v5, 1 }
  0x98   : > { %715 = vmatpush.msra.mxu0 %v695_v21  ;;  %735 = vmatpush.msra.mxu1 %v696_v22 }
  0x99   : > { %3449 = vst [vmem:[#allocation20_spill] sm:$0xff] %v2429_v8 }
  0x9a   : > { %716 = vmatpush.msra.mxu0 %v679_v28  ;;  %736 = vmatpush.msra.mxu1 %v680_v29  ;;  %3450 = vst [vmem:[#allocation21_spill] sm:$0xff] %v2431_v9 }
  0x9c   : > { %v636_v37 = vpop.permute.xlu1 %635  ;;  %717 = vmatpush.msra.mxu0 %v663_v31  ;;  %737 = vmatpush.msra.mxu1 %v664_v32  ;;  %v634_v38 = vpop.permute.xlu0 %633 }
  0x9d   : > { %v638_v39 = vsel %vm637_vm3, %v634_v38, %v636_v37  ;;  %v639_v40 = vsel %vm637_vm3, %v636_v37, %v634_v38 }
  0x9e   : > { %v647_v41 = vmul.f32 %v2368_v33, %v638_v39  ;;  %v648_v42 = vmul.f32 %v2370_v34, %v639_v40 }
  0xa0   : > { %718 = vmatpush.msra.mxu0 %v647_v41  ;;  %738 = vmatpush.msra.mxu1 %v648_v42 }
  0xa2   : > { %719 = vmatpush.msra.mxu0 %v2284_v0  ;;  %739 = vmatpush.msra.mxu1 %v2292_v1 }
  0xa4   : > { %v602_v50 = vpop.permute.xlu1 %601  ;;  %v620_v51 = vpop.permute.xlu0 %619 }
  0xa5   : > { %v622_v52 = vsel %vm621_vm4, %v618_v30, %v620_v51  ;;  %v623_v53 = vsel %vm621_vm4, %v620_v51, %v618_v30  ;;  %v606_v54 = vsel %vm605_vm5, %v602_v50, %v604_v47  ;;  %v607_v55 = vsel %vm605_vm5, %v604_v47, %v602_v50  ;;  %v815_v47 = vld [vmem:[%s3348_s8] sm:$0xff] }
  0xa6   : > { %v631_v56 = vmul.f32 %v2388_v45, %v623_v53  ;;  %v632_v57 = vmul.f32 %v2392_v46, %v622_v52  ;;  %v615_v58 = vmul.f32 %v2395_v48, %v607_v55  ;;  %v616_v59 = vmul.f32 %v2397_v49, %v606_v54 }
  0xa8   : > { %720 = vmatpush.msra.mxu0 %v631_v56  ;;  %740 = vmatpush.msra.mxu1 %v632_v57  ;;  %v1221_v56 = vld [vmem:[%s3350_s10 + $0x8] sm:$0xff] }
  0xaa   : > { %721 = vmatpush.msra.mxu0 %v615_v58  ;;  %741 = vmatpush.msra.mxu1 %v616_v59 }
  0xac   : > { %v588_v63 = vpop.permute.xlu1 %587  ;;  %v586_v0 = vpop.permute.xlu0 %585 }
  0xad   : > { %v590_v1 = vsel %vm589_vm6, %v586_v0, %v588_v63  ;;  %v591_v2 = vsel %vm589_vm6, %v588_v63, %v586_v0 }
  0xae   : > { %v599_v3 = vmul.f32 %v2415_v61, %v591_v2  ;;  %v600_v4 = vmul.f32 %v2417_v62, %v590_v1 }
  0xb0   : > { %722 = vmatpush.msra.mxu0 %v599_v3  ;;  %742 = vmatpush.msra.mxu1 %v600_v4 }
  0xb4   : > { %v571_v12 = vpop.permute.xlu0 %570  ;;  %v702_v20 = vpop.permute.xlu1 %701 }
  0xb5   : > { %v575_v13 = vsel %vm574_vm7, %v569_v7, %v571_v12  ;;  %v576_v14 = vsel %vm574_vm7, %v571_v12, %v569_v7 }
  0xb6   : > { %v583_v17 = vmul.f32 %v2429_v8, %v576_v14  ;;  %v584_v18 = vmul.f32 %v2431_v9, %v575_v13 }
  0xb8   : > { %723 = vmatpush.msra.mxu0 %v583_v17  ;;  %743 = vmatpush.msra.mxu1 %v584_v18 }
  0xb9   : > { %2038 = vmatmul.msk.f32.vlgmr.msra.gmra.mxu0 %vm704_vm8, %v697_v19  ;;  %2039 = vmatmul.msk.f32.vlgmr.msra.gmra.mxu1 %vm704_vm8, %v697_v19 }
 0x136   : > { %v725_v21 = vpop.f32.mrf.mxu0  ;;  %v745_v22 = vpop.f32.mrf.mxu1 }
 0x137   : > { %v726_v25 = vadd.f32 %v725_v21, %v702_v20  ;;  %v746_v26 = vadd.f32 %v745_v22, %v702_v20 }
 0x139   : > { %v748_v27 = vmax.f32 %v726_v25, 0.0  ;;  %v749_v28 = vmax.f32 %v746_v26, 0.0 }
 0x13b   : > { %798 = vrot.lane.b32.xlu1 %v748_v27, %s3371_s23  ;;  %806 = vrot.lane.b32.xlu2 %v748_v27, %s3373_s25 }
 0x13c   : > { %808 = vrot.lane.b32.xlu0 %v749_v28, %s3373_s25 }
 0x143   : > { %792 = vrot.lane.b32.xlu1 %v749_v28, %s3369_s26  ;;  %800 = vrot.lane.b32.xlu2 %v749_v28, %s3371_s23 }
 0x144   : > { %790 = vrot.lane.b32.xlu0 %v748_v27, %s3369_s26 }
 0x14b   : > { %774 = vrot.lane.b32.xlu1 %v748_v27, %s3367_s29  ;;  %782 = vrot.lane.b32.xlu2 %v748_v27, %s3365_s27 }
 0x14c   : > { %784 = vrot.lane.b32.xlu0 %v749_v28, %s3365_s27 }
 0x153   : > { %768 = vrot.lane.b32.xlu1 %v749_v28, %s3363_s0  ;;  %776 = vrot.lane.b32.xlu2 %v749_v28, %s3367_s29 }
 0x154   : > { %766 = vrot.lane.b32.xlu0 %v748_v27, %s3363_s0 }
 0x15b   : > { %750 = vrot.lane.b32.xlu1 %v748_v27, %s3452_s19  ;;  %758 = vrot.lane.b32.xlu2 %v748_v27, %s3453_s1 }
 0x15c   : > { %760 = vrot.lane.b32.xlu0 %v749_v28, %s3453_s1 }
 0x163   : > { %752 = vrot.lane.b32.xlu2 %v749_v28, %s3452_s19 }
 0x164   : > { %818 = vperm.xlu0 %2116, %v815_v47  }
 0x16c   : > { %1229 = vperm.xlu0 %2116, %v1221_v56  }
 0x195   : > { %v807_v29 = vpop.permute.xlu2 %806 }
 0x19d   : > { %v801_v30 = vpop.permute.xlu2 %800 }
 0x1a5   : > { %v783_v39 = vpop.permute.xlu2 %782 }
 0x1ad   : > { %v799_v31 = vpop.permute.xlu1 %798  ;;  %v777_v55 = vpop.permute.xlu2 %776 }
 0x1ae   : > { %v809_v32 = vpop.permute.xlu0 %808  ;;  %v802_v35 = vsel %vm669_vm0, %v799_v31, %v801_v30  ;;  %v803_v36 = vsel %vm669_vm0, %v801_v30, %v799_v31 }
 0x1af   : > { %v810_v37 = vsel %vm685_vm1, %v807_v29, %v809_v32  ;;  %v811_v38 = vsel %vm685_vm1, %v809_v32, %v807_v29  ;;  %v804_v42 = vmul.f32 %v802_v35, %v2338_v15  ;;  %v805_v43 = vmul.f32 %v803_v36, %v2340_v16  ;;  %v814_v32 = vld [vmem:[%s3347_s7] sm:$0xff]  ;;  %v2853_v16 = vld [vmem:[#allocation2 + $0x88] sm:$0xff] }
 0x1b0   : > { %v812_v40 = vmul.f32 %v810_v37, %v2330_v10  ;;  %v813_v41 = vmul.f32 %v811_v38, %v2332_v11  ;;  %v2855_v15 = vld [vmem:[#allocation2 + $0xc8] sm:$0xff]  ;;  %v1139_v10 = vld [vmem:[#allocation2 + $0x1b8] sm:$0xff] }
 0x1b2   : > { %831 = vmatpush.msra.mxu2 %v812_v40  ;;  %851 = vmatpush.msra.mxu3 %v813_v41 }
 0x1b4   : > { %832 = vmatpush.msra.mxu2 %v804_v42  ;;  %852 = vmatpush.msra.mxu3 %v805_v43  ;;  %v1220_v42 = vld [vmem:[%s3350_s10] sm:$0xff]  ;;  %v1481_v43 = vld [vmem:[%s3352_s12 + $0x8] sm:$0xff] }
 0x1b5   : > { %v793_v44 = vpop.permute.xlu1 %792  ;;  %v759_v3 = vpop.permute.xlu2 %758 }
 0x1b6   : > { %v791_v50 = vpop.permute.xlu0 %790 }
 0x1b7   : > { %v794_v51 = vsel %vm653_vm2, %v791_v50, %v793_v44  ;;  %v795_v52 = vsel %vm653_vm2, %v793_v44, %v791_v50 }
 0x1b8   : > { %v796_v53 = vmul.f32 %v794_v51, %v2352_v23  ;;  %v797_v54 = vmul.f32 %v795_v52, %v2354_v24  ;;  %v2831_v24 = vld [vmem:[#allocation2 + $0xd8] sm:$0xff]  ;;  %v2835_v23 = vld [vmem:[#allocation2 + $0x230] sm:$0xff] }
 0x1ba   : > { %833 = vmatpush.msra.mxu2 %v796_v53  ;;  %853 = vmatpush.msra.mxu3 %v797_v54 }
 0x1bd   : > { %v775_v57 = vpop.permute.xlu1 %774  ;;  %v753_v20 = vpop.permute.xlu2 %752 }
 0x1be   : > { %v785_v58 = vpop.permute.xlu0 %784  ;;  %v778_v1 = vsel %vm621_vm4, %v775_v57, %v777_v55  ;;  %v779_v2 = vsel %vm621_vm4, %v777_v55, %v775_v57 }
 0x1bf   : > { %v786_v59 = vsel %vm637_vm3, %v783_v39, %v785_v58  ;;  %v787_v60 = vsel %vm637_vm3, %v785_v58, %v783_v39  ;;  %v780_v4 = vmul.f32 %v779_v2, %v2388_v45  ;;  %v781_v5 = vmul.f32 %v778_v1, %v2392_v46  ;;  %v2861_v46 = vld [vmem:[#allocation2 + $0x220] sm:$0xff] }
 0x1c0   : > { %v788_v63 = vmul.f32 %v786_v59, %v2368_v33  ;;  %v789_v0 = vmul.f32 %v787_v60, %v2370_v34  ;;  %3471 = vst [vmem:[#allocation36_spill] sm:$0xff] %v2861_v46  ;;  %v2865_v45 = vld [vmem:[#allocation2 + $0x80] sm:$0xff] }
 0x1c1   : > { %v2880_v34 = vld [vmem:[#allocation2 + $0x200] sm:$0xff] }
 0x1c2   : > { %834 = vmatpush.msra.mxu2 %v788_v63  ;;  %854 = vmatpush.msra.mxu3 %v789_v0  ;;  %v1480_v63 = vld [vmem:[%s3352_s12] sm:$0xff]  ;;  %3475 = vst [vmem:[#allocation40_spill] sm:$0xff] %v2880_v34 }
 0x1c4   : > { %835 = vmatpush.msra.mxu2 %v748_v27  ;;  %855 = vmatpush.msra.mxu3 %v749_v28 }
 0x1c5   : > { %v769_v7 = vpop.permute.xlu1 %768 }
 0x1c6   : > { %836 = vmatpush.msra.mxu2 %v780_v4  ;;  %856 = vmatpush.msra.mxu3 %v781_v5  ;;  %v767_v12 = vpop.permute.xlu0 %766  ;;  %v897_v4 = vld [vmem:[%s3343_s3 + $0x78] sm:$0xff] }
 0x1c7   : > { %v770_v13 = vsel %vm605_vm5, %v767_v12, %v769_v7  ;;  %v771_v14 = vsel %vm605_vm5, %v769_v7, %v767_v12  ;;  %v913_v5 = vld [vmem:[%s3343_s3 + $0xf8] sm:$0xff]  ;;  %v896_v7 = vld [vmem:[%s3343_s3 + $0x70] sm:$0xff]  ;;  %914 = vmatpush.msrb.mxu0 %v897_v4  ;;  %v883_v4 = vld [vmem:[%s3343_s3 + $0x8] sm:$0xff] }
 0x1c8   : > { %v772_v17 = vmul.f32 %v771_v14, %v2395_v48  ;;  %v773_v18 = vmul.f32 %v770_v13, %v2397_v49  ;;  %934 = vmatpush.msrb.mxu1 %v913_v5  ;;  %v912_v12 = vld [vmem:[%s3343_s3 + $0xf0] sm:$0xff]  ;;  %v895_v13 = vld [vmem:[%s3343_s3 + $0x68] sm:$0xff] }
 0x1c9   : > { %915 = vmatpush.msrb.mxu0 %v896_v7  ;;  %v911_v14 = vld [vmem:[%s3343_s3 + $0xe8] sm:$0xff]  ;;  %v882_v7 = vld [vmem:[%s3343_s3] sm:$0xff]  ;;  %v2840_v49 = vld [vmem:[#allocation2 + $0xd0] sm:$0xff] }
 0x1ca   : > { %837 = vmatpush.msra.mxu2 %v772_v17  ;;  %857 = vmatpush.msra.mxu3 %v773_v18  ;;  %v894_v17 = vld [vmem:[%s3343_s3 + $0x60] sm:$0xff]  ;;  %v899_v5 = vld [vmem:[%s3343_s3 + $0x88] sm:$0xff] }
 0x1cb   : > { %935 = vmatpush.msrb.mxu1 %v912_v12  ;;  %916 = vmatpush.msrb.mxu0 %v895_v13  ;;  %v910_v18 = vld [vmem:[%s3343_s3 + $0xe0] sm:$0xff]  ;;  %v2849_v48 = vld [vmem:[#allocation2 + $0x228] sm:$0xff] }
 0x1cc   : > { %v898_v12 = vld [vmem:[%s3343_s3 + $0x80] sm:$0xff]  ;;  %3470 = vst [vmem:[#allocation35_spill] sm:$0xff] %v2849_v48 }
 0x1cd   : > { %v751_v19 = vpop.permute.xlu1 %750  ;;  %936 = vmatpush.msrb.mxu1 %v911_v14  ;;  %917 = vmatpush.msrb.mxu0 %v894_v17 }
 0x1ce   : > { %v761_v21 = vpop.permute.xlu0 %760  ;;  %v754_v22 = vsel %vm574_vm7, %v751_v19, %v753_v20  ;;  %v755_v25 = vsel %vm574_vm7, %v753_v20, %v751_v19  ;;  %v893_v20 = vld [vmem:[%s3343_s3 + $0x58] sm:$0xff] }
 0x1cf   : > { %v762_v26 = vsel %vm589_vm6, %v759_v3, %v761_v21  ;;  %v763_v27 = vsel %vm589_vm6, %v761_v21, %v759_v3  ;;  %v756_v30 = vmul.f32 %v755_v25, %v2429_v8  ;;  %v757_v31 = vmul.f32 %v754_v22, %v2431_v9  ;;  %v909_v21 = vld [vmem:[%s3343_s3 + $0xd8] sm:$0xff]  ;;  %937 = vmatpush.msrb.mxu1 %v910_v18  ;;  %v892_v22 = vld [vmem:[%s3343_s3 + $0x50] sm:$0xff]  ;;  %v2811_v9 = vld [vmem:[#allocation2 + $0xe8] sm:$0xff] }
 0x1d0   : > { %v764_v28 = vmul.f32 %v763_v27, %v2415_v61  ;;  %v765_v29 = vmul.f32 %v762_v26, %v2417_v62  ;;  %918 = vmatpush.msrb.mxu0 %v893_v20  ;;  %v908_v25 = vld [vmem:[%s3343_s3 + $0xd0] sm:$0xff]  ;;  %v891_v26 = vld [vmem:[%s3343_s3 + $0x48] sm:$0xff]  ;;  %v2709_v18 = vld [vmem:[#allocation2 + $0x38] sm:$0xff] }
 0x1d1   : > { %938 = vmatpush.msrb.mxu1 %v909_v21  ;;  %v907_v27 = vld [vmem:[%s3343_s3 + $0xc8] sm:$0xff]  ;;  %v2711_v20 = vld [vmem:[#allocation2 + $0x78] sm:$0xff]  ;;  %v2713_v21 = vld [vmem:[#allocation2 + $0x30] sm:$0xff] }
 0x1d2   : > { %838 = vmatpush.msra.mxu2 %v764_v28  ;;  %858 = vmatpush.msra.mxu3 %v765_v29  ;;  %v890_v28 = vld [vmem:[%s3343_s3 + $0x40] sm:$0xff]  ;;  %v2829_v61 = vld [vmem:[#allocation2 + $0x98] sm:$0xff] }
 0x1d3   : > { %919 = vmatpush.msrb.mxu0 %v892_v22  ;;  %939 = vmatpush.msrb.mxu1 %v908_v25  ;;  %v906_v29 = vld [vmem:[%s3343_s3 + $0xc0] sm:$0xff] }
 0x1d4   : > { %839 = vmatpush.msra.mxu2 %v756_v30  ;;  %859 = vmatpush.msra.mxu3 %v757_v31  ;;  %v2816_v8 = vld [vmem:[#allocation2 + $0x100] sm:$0xff] }
 0x1d5   : > { %2040 = vmatmul.msk.f32.vlgmr.msra.gmra.mxu2 %vm704_vm8, %v814_v32  ;;  %2041 = vmatmul.msk.f32.vlgmr.msra.gmra.mxu3 %vm704_vm8, %v814_v32  ;;  %v889_v32 = vld [vmem:[%s3343_s3 + $0x38] sm:$0xff]  ;;  %v2821_v62 = vld [vmem:[#allocation2 + $0xe0] sm:$0xff] }
 0x1d6   : > { %v819_v35 = vpop.permute.xlu0 %818  ;;  %920 = vmatpush.msrb.mxu0 %v891_v26  ;;  %940 = vmatpush.msrb.mxu1 %v907_v27  ;;  %v2721_v26 = vld [vmem:[#allocation2 + $0x70] sm:$0xff] }
 0x1d7   : > { %974 = vmatpush.msrb.mxu2 %v2709_v18  ;;  %1003 = vmatpush.msrb.mxu3 %v2711_v20 }
 0x1d8   : > { %921 = vmatpush.msrb.mxu0 %v890_v28  ;;  %941 = vmatpush.msrb.mxu1 %v906_v29  ;;  %v2725_v29 = vld [vmem:[#allocation2 + $0x28] sm:$0xff] }
 0x1d9   : > { %975 = vmatpush.msrb.mxu2 %v2713_v21  ;;  %1004 = vmatpush.msrb.mxu3 %v2721_v26 }
 0x1da   : > { %922 = vmatpush.msrb.mxu0 %v889_v32  ;;  %v2733_v32 = vld [vmem:[#allocation2 + $0x20] sm:$0xff] }
 0x1db   : > { %976 = vmatpush.msrb.mxu2 %v2725_v29 }
 0x1dd   : > { %977 = vmatpush.msrb.mxu2 %v2733_v32 }
 0x1de   : > { %v2559_v51 = vpop.permute.xlu0 %1229 }
 0x258   : > { %v841_v36 = vpop.f32.mrf.mxu2  ;;  %v861_v37 = vpop.f32.mrf.mxu3 }
 0x259   : > { %v842_v38 = vadd.f32 %v841_v36, %v819_v35  ;;  %v862_v39 = vadd.f32 %v861_v37, %v819_v35  ;;  %v905_v37 = vld [vmem:[%s3343_s3 + $0xb8] sm:$0xff] }
 0x25a   : > { %942 = vmatpush.msrb.mxu1 %v905_v37  ;;  %v2735_v37 = vld [vmem:[#allocation2 + $0x60] sm:$0xff] }
 0x25b   : > { %v2519_v40 = vmax.f32 %v842_v38, 0.0  ;;  %v2521_v41 = vmax.f32 %v862_v39, 0.0  ;;  %v888_v38 = vld [vmem:[%s3343_s3 + $0x30] sm:$0xff] }
 0x25c   : > { %v904_v39 = vld [vmem:[%s3343_s3 + $0xb0] sm:$0xff]  ;;  %923 = vmatpush.msrb.mxu0 %v888_v38  ;;  %v2744_v38 = vld [vmem:[#allocation2 + $0x58] sm:$0xff] }
 0x25d   : > { %3454 = vst [vmem:[#allocation22_spill] sm:$0xff] %v2519_v40  ;;  %1697 = vrot.lane.b32.xlu0 %v2521_v41, %s3367_s29  ;;  %868 = vrot.lane.b32.xlu2 %v2521_v41, %s3365_s27 }
 0x25e   : > { %3455 = vst [vmem:[#allocation23_spill] sm:$0xff] %v2521_v41  ;;  %866 = vrot.lane.b32.xlu1 %v2519_v40, %s3365_s27  ;;  %943 = vmatpush.msrb.mxu1 %v904_v39  ;;  %v2746_v39 = vld [vmem:[#allocation2 + $0x178] sm:$0xff]  ;;  %s3491_s27 = smov 1  }
 0x265   : > { %1673 = vrot.lane.b32.xlu0 %v2521_v41, %s3363_s0  ;;  %1224 = vperm.xlu2 %2122, %v1220_v42   ;;  %v887_v42 = vld [vmem:[%s3343_s3 + $0x28] sm:$0xff] }
 0x266   : > { %924 = vmatpush.msrb.mxu0 %v887_v42  ;;  %v2750_v42 = vld [vmem:[#allocation2 + $0x128] sm:$0xff] }
 0x26d   : > { %1649 = vrot.lane.b32.xlu0 %v2521_v41, %s3453_s1  ;;  %1489 = vperm.xlu2 %2122, %v1481_v43   ;;  %v903_v43 = vld [vmem:[%s3343_s3 + $0xa8] sm:$0xff] }
 0x26e   : > { %944 = vmatpush.msrb.mxu1 %v903_v43  ;;  %v2753_v43 = vld [vmem:[#allocation2 + $0x10] sm:$0xff] }
 0x275   : > { %1625 = vrot.lane.b32.xlu0 %v2521_v41, %s3452_s19  ;;  %1691 = vrot.lane.b32.xlu2 %v2519_v40, %s3367_s29 }
 0x27d   : > { %1787 = vrot.lane.b32.xlu2 %v2521_v41, %s3373_s25  ;;  %s3469_s25 = smov 113  }
 0x285   : > { %1667 = vrot.lane.b32.xlu2 %v2519_v40, %s3363_s0  ;;  %s3492_s0 = smov 127  }
 0x28d   : > { %1763 = vrot.lane.b32.xlu2 %v2521_v41, %s3371_s23 }
 0x295   : > { %1643 = vrot.lane.b32.xlu2 %v2519_v40, %s3453_s1 }
 0x29d   : > { %1739 = vrot.lane.b32.xlu2 %v2521_v41, %s3369_s26 }
 0x2a5   : > { %1619 = vrot.lane.b32.xlu2 %v2519_v40, %s3452_s19 }
 0x2b7   : > { %v869_v44 = vpop.permute.xlu2 %868 }
 0x2bf   : > { %v2555_v47 = vpop.permute.xlu2 %1224 }
 0x2c7   : > { %v2557_v50 = vpop.permute.xlu2 %1489 }
 0x2c8   : > { %3456 = vst [vmem:[#allocation24_spill] sm:$0xff] %v2557_v50 }
 0x2cf   : > { %v2561_v52 = vpop.permute.xlu2 %1691  ;;  %v2581_v59 = vpop.permute.xlu0 %1697 }
 0x2d0   : > { %3457 = vst [vmem:[#allocation25_spill] sm:$0xff] %v2561_v52  ;;  %v867_v53 = vpop.permute.xlu1 %866  ;;  %v2867_v52 = vld [vmem:[#allocation2 + $0xc0] sm:$0xff] }
 0x2d1   : > { %v2565_v54 = vsel %vm637_vm3, %v867_v53, %v869_v44  ;;  %v2569_v55 = vsel %vm637_vm3, %v869_v44, %v867_v53  ;;  %3460 = vst [vmem:[#allocation28_spill] sm:$0xff] %v2581_v59  ;;  %v886_v44 = vld [vmem:[%s3343_s3 + $0x20] sm:$0xff]  ;;  %v2871_v59 = vld [vmem:[#allocation2 + $0x218] sm:$0xff] }
 0x2d2   : > { %3458 = vst [vmem:[#allocation26_spill] sm:$0xff] %v2565_v54  ;;  %v2573_v56 = vmax.f32 %v2519_v40, %v2565_v54  ;;  %v2577_v57 = vmax.f32 %v2521_v41, %v2569_v55  ;;  %v902_v53 = vld [vmem:[%s3343_s3 + $0xa0] sm:$0xff]  ;;  %925 = vmatpush.msrb.mxu0 %v886_v44  ;;  %v2755_v44 = vld [vmem:[#allocation2 + $0x50] sm:$0xff]  ;;  %v2809_v54 = vld [vmem:[#allocation2 + $0xa8] sm:$0xff] }
 0x2d3   : > { %3459 = vst [vmem:[#allocation27_spill] sm:$0xff] %v2569_v55  ;;  %945 = vmatpush.msrb.mxu1 %v902_v53  ;;  %v2758_v53 = vld [vmem:[#allocation2 + $0x170] sm:$0xff] }
 0x2d4   : > { %v2117_v58 = vpack.i.bf16 %v2577_v57, %v2573_v56  ;;  %v2806_v55 = vld [vmem:[#allocation2 + $0x150] sm:$0xff]  ;;  %3472 = vst [vmem:[#allocation37_spill] sm:$0xff] %v2871_v59 }
 0x2d5   : > { %v2874_v41 = vld [vmem:[#allocation2 + $0x210] sm:$0xff] }
 0x2d6   : > { %2118 = vrot.lane.b32.xlu1 %v2117_v58, %s3371_s23  ;;  %v885_v58 = vld [vmem:[%s3343_s3 + $0x18] sm:$0xff]  ;;  %3473 = vst [vmem:[#allocation38_spill] sm:$0xff] %v2874_v41 }
 0x2d7   : > { %v2584_v60 = vpop.permute.xlu2 %1787  ;;  %v1674_v0 = vpop.permute.xlu0 %1673  ;;  %926 = vmatpush.msrb.mxu0 %v885_v58  ;;  %v2762_v58 = vld [vmem:[#allocation2 + $0x120] sm:$0xff] }
 0x2d8   : > { %3461 = vst [vmem:[#allocation29_spill] sm:$0xff] %v2584_v60  ;;  %v1138_v60 = vld [vmem:[#allocation2 + $0x1b0] sm:$0xff] }
 0x2de   : > { %1484 = vperm.xlu1 %2115, %v1480_v63   ;;  %v901_v63 = vld [vmem:[%s3343_s3 + $0x98] sm:$0xff] }
 0x2df   : > { %v1668_v1 = vpop.permute.xlu2 %1667  ;;  %v1650_v30 = vpop.permute.xlu0 %1649  ;;  %946 = vmatpush.msrb.mxu1 %v901_v63  ;;  %v2764_v63 = vld [vmem:[#allocation2 + $0x168] sm:$0xff] }
 0x2e0   : > { %v2591_v2 = vsel %vm605_vm5, %v1668_v1, %v1674_v0  ;;  %v2595_v3 = vsel %vm605_vm5, %v1674_v0, %v1668_v1  ;;  %v884_v0 = vld [vmem:[%s3343_s3 + $0x10] sm:$0xff] }
 0x2e1   : > { %3462 = vst [vmem:[#allocation30_spill] sm:$0xff] %v2591_v2  ;;  %v900_v1 = vld [vmem:[%s3343_s3 + $0x90] sm:$0xff]  ;;  %927 = vmatpush.msrb.mxu0 %v884_v0  ;;  %v2767_v0 = vld [vmem:[#allocation2 + $0x8] sm:$0xff] }
 0x2e2   : > { %3463 = vst [vmem:[#allocation31_spill] sm:$0xff] %v2595_v3  ;;  %947 = vmatpush.msrb.mxu1 %v900_v1  ;;  %v2769_v1 = vld [vmem:[#allocation2 + $0x48] sm:$0xff]  ;;  %v2838_v2 = vld [vmem:[#allocation2 + $0x90] sm:$0xff] }
 0x2e3   : > { %928 = vmatpush.msrb.mxu0 %v883_v4  ;;  %v2774_v4 = vld [vmem:[#allocation2 + $0x118] sm:$0xff]  ;;  %v2847_v3 = vld [vmem:[#allocation2 + $0x148] sm:$0xff] }
 0x2e4   : > { %948 = vmatpush.msrb.mxu1 %v899_v5  ;;  %v2776_v5 = vld [vmem:[#allocation2 + $0x160] sm:$0xff] }
 0x2e5   : > { %929 = vmatpush.msrb.mxu0 %v882_v7  ;;  %v2779_v7 = vld [vmem:[#allocation2] sm:$0xff] }
 0x2e6   : > { %1781 = vrot.lane.b32.xlu1 %v2519_v40, %s3464_s30  ;;  %949 = vmatpush.msrb.mxu1 %v898_v12  ;;  %v2781_v12 = vld [vmem:[#allocation2 + $0x40] sm:$0xff] }
 0x2e7   : > { %v2623_v19 = vpop.permute.xlu2 %1763 }
 0x2e8   : > { %3465 = vst [vmem:[#allocation32_spill] sm:$0xff] %v2623_v19  ;;  %1119 = vmatpush.msra.mxu1 %v2746_v39  ;;  %v2859_v19 = vld [vmem:[#allocation2 + $0x140] sm:$0xff] }
 0x2ea   : > { %1120 = vmatpush.msra.mxu1 %v2758_v53 }
 0x2ec   : > { %1121 = vmatpush.msra.mxu1 %v2764_v63 }
 0x2ee   : > { %1757 = vrot.lane.b32.xlu1 %v2519_v40, %s3466_s22  ;;  %1122 = vmatpush.msra.mxu1 %v2776_v5 }
 0x2ef   : > { %v1644_v31 = vpop.permute.xlu2 %1643 }
 0x2f0   : > { %v2656_v35 = vsel %vm589_vm6, %v1644_v31, %v1650_v30  ;;  %v2660_v36 = vsel %vm589_vm6, %v1650_v30, %v1644_v31  ;;  %v2727_v30 = vld [vmem:[#allocation2 + $0x68] sm:$0xff]  ;;  %v2731_v31 = vld [vmem:[#allocation2 + $0x138] sm:$0xff] }
 0x2f1   : > { %3467 = vst [vmem:[#allocation33_spill] sm:$0xff] %v2656_v35  ;;  %1005 = vmatpush.msrb.mxu3 %v2727_v30  ;;  %1090 = vmatpush.msra.mxu0 %v2731_v31  ;;  %v2819_v35 = vld [vmem:[#allocation2 + $0xa0] sm:$0xff] }
 0x2f2   : > { %3468 = vst [vmem:[#allocation34_spill] sm:$0xff] %v2660_v36  ;;  %v2826_v36 = vld [vmem:[#allocation2 + $0x238] sm:$0xff] }
 0x2f3   : > { %1006 = vmatpush.msrb.mxu3 %v2735_v37 }
 0x2f5   : > { %1007 = vmatpush.msrb.mxu3 %v2744_v38 }
 0x2f6   : > { %1733 = vrot.lane.b32.xlu1 %v2519_v40, %s3469_s25  ;;  %v2877_v40 = vld [vmem:[#allocation2 + $0x208] sm:$0xff] }
 0x2f7   : > { %1008 = vmatpush.msrb.mxu3 %v2755_v44  ;;  %3474 = vst [vmem:[#allocation39_spill] sm:$0xff] %v2877_v40 }
 0x2f9   : > { %1009 = vmatpush.msrb.mxu3 %v2769_v1 }
 0x2fb   : > { %1010 = vmatpush.msrb.mxu3 %v2781_v12 }
 0x348   : > { %v2119_v13 = vpop.permute.xlu1 %2118 }
 0x349   : > { %v2121_v14 = vunpack.i.h.bf16 %v2119_v13  ;;  %v2120_v17 = vunpack.i.l.bf16 %v2119_v13  ;;  %v2786_v13 = vld [vmem:[#allocation2 + $0xb8] sm:$0xff] }
 0x34b   : > { %v878_v22 = vsel %vm669_vm0, %v2120_v17, %v2121_v14  ;;  %v879_v25 = vsel %vm669_vm0, %v2121_v14, %v2120_v17  ;;  %v2788_v14 = vld [vmem:[#allocation2 + $0xf8] sm:$0xff]  ;;  %v2791_v17 = vld [vmem:[#allocation2 + $0x110] sm:$0xff] }
 0x34c   : > { %v880_v27 = vmax.f32 %v2573_v56, %v878_v22  ;;  %v881_v28 = vmax.f32 %v2577_v57, %v879_v25  ;;  %v2739_v56 = vld [vmem:[#allocation2 + $0x130] sm:$0xff]  ;;  %v2742_v57 = vld [vmem:[#allocation2 + $0x18] sm:$0xff]  ;;  %1061 = vmatpush.msra.mxu3 %v2788_v14 }
 0x34d   : > { %1091 = vmatpush.msra.mxu0 %v2739_v56  ;;  %978 = vmatpush.msrb.mxu2 %v2742_v57  ;;  %v2794_v22 = vld [vmem:[#allocation2 + $0x158] sm:$0xff]  ;;  %v2798_v25 = vld [vmem:[#allocation2 + $0xb0] sm:$0xff] }
 0x34e   : > { %930 = vmatmul.f32.vlgmr.msrb.gmra.mxu0 %v880_v27  ;;  %950 = vmatmul.f32.vlgmr.msrb.gmra.mxu1 %v881_v28  ;;  %v2800_v27 = vld [vmem:[#allocation2 + $0xf0] sm:$0xff]  ;;  %v2804_v28 = vld [vmem:[#allocation2 + $0x108] sm:$0xff] }
 0x34f   : > { %1092 = vmatpush.msra.mxu0 %v2750_v42  ;;  %979 = vmatpush.msrb.mxu2 %v2753_v43 }
 0x350   : > { %1123 = vmatpush.msra.mxu1 %v2794_v22  ;;  %1062 = vmatpush.msra.mxu3 %v2800_v27 }
 0x351   : > { %1093 = vmatpush.msra.mxu0 %v2762_v58  ;;  %980 = vmatpush.msrb.mxu2 %v2767_v0 }
 0x352   : > { %1124 = vmatpush.msra.mxu1 %v2806_v55  ;;  %1063 = vmatpush.msra.mxu3 %v2811_v9 }
 0x353   : > { %1094 = vmatpush.msra.mxu0 %v2774_v4  ;;  %981 = vmatpush.msrb.mxu2 %v2779_v7 }
 0x354   : > { %1064 = vmatpush.msra.mxu3 %v2821_v62  ;;  %1125 = vmatpush.msra.mxu1 %v2847_v3 }
 0x355   : > { %1032 = vmatpush.msra.mxu2 %v2786_v13  ;;  %1095 = vmatpush.msra.mxu0 %v2791_v17 }
 0x356   : > { %1065 = vmatpush.msra.mxu3 %v2831_v24  ;;  %1126 = vmatpush.msra.mxu1 %v2859_v19 }
 0x357   : > { %1033 = vmatpush.msra.mxu2 %v2798_v25  ;;  %1096 = vmatpush.msra.mxu0 %v2804_v28 }
 0x358   : > { %1066 = vmatpush.msra.mxu3 %v2840_v49 }
 0x359   : > { %1034 = vmatpush.msra.mxu2 %v2809_v54  ;;  %1097 = vmatpush.msra.mxu0 %v2816_v8 }
 0x35a   : > { %1067 = vmatpush.msra.mxu3 %v2855_v15 }
 0x35b   : > { %1035 = vmatpush.msra.mxu2 %v2819_v35  ;;  %1206 = vmatpush.msrb.mxu0 %v2826_v36 }
 0x35c   : > { %1068 = vmatpush.msra.mxu3 %v2867_v52 }
 0x35d   : > { %1036 = vmatpush.msra.mxu2 %v2829_v61  ;;  %1207 = vmatpush.msrb.mxu0 %v2835_v23 }
 0x35f   : > { %1037 = vmatpush.msra.mxu2 %v2838_v2  ;;  %1208 = vmatpush.msrb.mxu0 %v2849_v48  ;;  %v1133_v48 = vld [vmem:[#allocation2 + $0x188] sm:$0xff] }
 0x361   : > { %1038 = vmatpush.msra.mxu2 %v2853_v16  ;;  %1209 = vmatpush.msrb.mxu0 %v2861_v46  ;;  %v2902_v46 = vld [vmem:[#allocation2 + $0x1d8] sm:$0xff] }
 0x363   : > { %1039 = vmatpush.msra.mxu2 %v2865_v45  ;;  %1210 = vmatpush.msrb.mxu0 %v2871_v59  ;;  %v1135_v59 = vld [vmem:[#allocation2 + $0x198] sm:$0xff] }
 0x365   : > { %1211 = vmatpush.msrb.mxu0 %v2874_v41  ;;  %v2892_v41 = vld [vmem:[#allocation2 + $0x1e8] sm:$0xff] }
 0x366   : > { %3476 = vst [vmem:[#allocation41_spill] sm:$0xff] %v2892_v41 }
 0x367   : > { %1212 = vmatpush.msrb.mxu0 %v2877_v40  ;;  %v2889_v40 = vld [vmem:[#allocation2 + $0x1f0] sm:$0xff] }
 0x369   : > { %1213 = vmatpush.msrb.mxu0 %v2880_v34  ;;  %v1137_v34 = vld [vmem:[#allocation2 + $0x1a8] sm:$0xff] }
 0x3cb   : > { %v931_v33 = vpop.f32.mrf.mxu0  ;;  %v951_v50 = vpop.f32.mrf.mxu1 }
 0x3cc   : > { %v952_v11 = vadd.f32 %v951_v50, %v931_v33  ;;  %v1136_v33 = vld [vmem:[#allocation2 + $0x1a0] sm:$0xff] }
 0x3cd   : > { %v2896_v50 = vld [vmem:[#allocation2 + $0x1e0] sm:$0xff] }
 0x3ce   : > { %2042 = vmatmul.msk.f32.vlgmr.msrb.gmra.mxu2 %vm962_vm9, %v952_v11  ;;  %2043 = vmatmul.msk.f32.vlgmr.msrb.gmra.mxu3 %vm962_vm9, %v952_v11  ;;  %3477 = vst [vmem:[#allocation42_spill] sm:$0xff] %v2896_v50 }
 0x3cf   : > { %2046 = vmatmul.msk.f32.vlgmr.msra.gmra.mxu0 %vm962_vm9, %v952_v11  ;;  %2047 = vmatmul.msk.f32.vlgmr.msra.gmra.mxu1 %vm962_vm9, %v952_v11 }
 0x3d0   : > { %1148 = vmatpush.msrb.mxu2 %v1139_v10  ;;  %1177 = vmatpush.msrb.mxu3 %v2883_v6 }
 0x3d1   : > { %1323 = vmatpush.msra.mxu0 %v2786_v13  ;;  %v1134_v13 = vld [vmem:[#allocation2 + $0x190] sm:$0xff] }
 0x3d2   : > { %1149 = vmatpush.msrb.mxu2 %v1138_v60  ;;  %1178 = vmatpush.msrb.mxu3 %v2889_v40 }
 0x3d3   : > { %1324 = vmatpush.msra.mxu0 %v2798_v25  ;;  %v2907_v25 = vld [vmem:[#allocation2 + $0x1d0] sm:$0xff] }
 0x3d4   : > { %1150 = vmatpush.msrb.mxu2 %v1137_v34  ;;  %1179 = vmatpush.msrb.mxu3 %v2892_v41  ;;  %v2915_v41 = vld [vmem:[#allocation2 + $0x1c0] sm:$0xff] }
 0x3d5   : > { %1325 = vmatpush.msra.mxu0 %v2809_v54  ;;  %v2911_v54 = vld [vmem:[#allocation2 + $0x1c8] sm:$0xff] }
 0x3d6   : > { %1151 = vmatpush.msrb.mxu2 %v1136_v33  ;;  %1180 = vmatpush.msrb.mxu3 %v2896_v50  ;;  %v1132_v50 = vld [vmem:[#allocation2 + $0x180] sm:$0xff] }
 0x3d7   : > { %2044 = vmatmul.msk.f32.vlgmr.msra.gmra.mxu2 %vm962_vm9, %v952_v11  ;;  %2045 = vmatmul.msk.f32.vlgmr.msra.gmra.mxu3 %vm962_vm9, %v952_v11 }
 0x3d8   : > { %2050 = vmatmul.msk.f32.vlgmr.msrb.gmra.mxu0 %vm962_vm9, %v952_v11  ;;  %1152 = vmatpush.msrb.mxu2 %v1135_v59 }
 0x3d9   : > { %1181 = vmatpush.msrb.mxu3 %v2902_v46  ;;  %1326 = vmatpush.msra.mxu0 %v2819_v35  ;;  %v3484_v35 = vld [vmem:[#allocation39_spill] sm:$0xff] }
 0x3da   : > { %1153 = vmatpush.msrb.mxu2 %v1134_v13 }
 0x3db   : > { %1182 = vmatpush.msrb.mxu3 %v2907_v25  ;;  %1327 = vmatpush.msra.mxu0 %v2829_v61 }
 0x3dc   : > { %1154 = vmatpush.msrb.mxu2 %v1133_v48 }
 0x3dd   : > { %1183 = vmatpush.msrb.mxu3 %v2911_v54  ;;  %1328 = vmatpush.msra.mxu0 %v2838_v2  ;;  %v3479_v2 = vld [vmem:[#allocation35_spill] sm:$0xff] }
 0x3de   : > { %1155 = vmatpush.msrb.mxu2 %v1132_v50 }
 0x3df   : > { %1184 = vmatpush.msrb.mxu3 %v2915_v41  ;;  %2048 = vmatmul.msk.f32.vlgmr.msrb.gmra.mxu2 %vm962_vm9, %v952_v11 }
 0x3e0   : > { %2049 = vmatmul.msk.f32.vlgmr.msrb.gmra.mxu3 %vm962_vm9, %v952_v11  ;;  %1277 = vmatpush.msra.mxu2 %v2709_v18  ;;  %v3485_v18 = vld [vmem:[#allocation40_spill] sm:$0xff] }
 0x3e1   : > { %1300 = vmatpush.msra.mxu3 %v2711_v20  ;;  %1329 = vmatpush.msra.mxu0 %v2853_v16  ;;  %v1555_v20 = vld [vmem:[%s3344_s4 + $0x40] sm:$0xff] }
 0x3e2   : > { %1278 = vmatpush.msra.mxu2 %v2713_v21  ;;  %v1551_v21 = vld [vmem:[%s3344_s4 + $0x20] sm:$0xff] }
 0x3e3   : > { %1301 = vmatpush.msra.mxu3 %v2721_v26  ;;  %1330 = vmatpush.msra.mxu0 %v2865_v45 }
 0x3e4   : > { %1279 = vmatpush.msra.mxu2 %v2725_v29  ;;  %v1549_v29 = vld [vmem:[%s3344_s4 + $0x10] sm:$0xff] }
 0x3e5   : > { %1415 = vmatpush.msrb.mxu0 %v1139_v10  ;;  %1302 = vmatpush.msra.mxu3 %v2727_v30  ;;  %v3486_v30 = vld [vmem:[#allocation29_spill] sm:$0xff] }
 0x3e6   : > { %1280 = vmatpush.msra.mxu2 %v2733_v32 }
 0x3e7   : > { %1416 = vmatpush.msrb.mxu0 %v1138_v60  ;;  %1303 = vmatpush.msra.mxu3 %v2735_v37  ;;  %v3478_v60 = vld [vmem:[#allocation41_spill] sm:$0xff] }
 0x3e8   : > { %1281 = vmatpush.msra.mxu2 %v2742_v57  ;;  %v1547_v37 = vld [vmem:[%s3344_s4] sm:$0xff] }
 0x3e9   : > { %1417 = vmatpush.msrb.mxu0 %v1137_v34  ;;  %1304 = vmatpush.msra.mxu3 %v2744_v38 }
 0x3ea   : > { %1282 = vmatpush.msra.mxu2 %v2753_v43 }
 0x3eb   : > { %1418 = vmatpush.msrb.mxu0 %v1136_v33  ;;  %1305 = vmatpush.msra.mxu3 %v2755_v44  ;;  %v1479_v33 = vld [vmem:[%s3351_s11 + $0x18] sm:$0xff] }
 0x3ec   : > { %1283 = vmatpush.msra.mxu2 %v2767_v0 }
 0x3ed   : > { %1419 = vmatpush.msrb.mxu0 %v1135_v59  ;;  %1306 = vmatpush.msra.mxu3 %v2769_v1 }
 0x3ee   : > { %1284 = vmatpush.msra.mxu2 %v2779_v7 }
 0x3ef   : > { %1420 = vmatpush.msrb.mxu0 %v1134_v13  ;;  %1307 = vmatpush.msra.mxu3 %v2781_v12  ;;  %v1560_v13 = vld [vmem:[%s3344_s4 + $0x68] sm:$0xff] }
 0x3f0   : > { %1346 = vmatpush.msrb.mxu2 %v2788_v14 }
 0x3f1   : > { %1369 = vmatpush.msrb.mxu3 %v2731_v31  ;;  %1421 = vmatpush.msrb.mxu0 %v1133_v48 }
 0x3f2   : > { %1347 = vmatpush.msrb.mxu2 %v2800_v27 }
 0x3f3   : > { %1370 = vmatpush.msrb.mxu3 %v2739_v56  ;;  %1422 = vmatpush.msrb.mxu0 %v1132_v50  ;;  %v3488_v56 = vld [vmem:[#allocation6_spill] sm:$0xff]  ;;  %v1562_v50 = vld [vmem:[%s3344_s4 + $0x78] sm:$0xff] }
 0x3f4   : > { %1348 = vmatpush.msrb.mxu2 %v2811_v9 }
 0x3f5   : > { %1371 = vmatpush.msrb.mxu3 %v2750_v42 }
 0x3f6   : > { %1349 = vmatpush.msrb.mxu2 %v2821_v62  ;;  %v1219_v62 = vld [vmem:[%s3349_s9 + $0x8] sm:$0xff] }
 0x3f7   : > { %1372 = vmatpush.msrb.mxu3 %v2762_v58 }
 0x3f8   : > { %1350 = vmatpush.msrb.mxu2 %v2831_v24 }
 0x3f9   : > { %1373 = vmatpush.msrb.mxu3 %v2774_v4 }
 0x3fa   : > { %1351 = vmatpush.msrb.mxu2 %v2840_v49 }
 0x3fb   : > { %1374 = vmatpush.msrb.mxu3 %v2791_v17 }
 0x3fc   : > { %1352 = vmatpush.msrb.mxu2 %v2855_v15  ;;  %v1218_v15 = vld [vmem:[%s3349_s9] sm:$0xff] }
 0x3fd   : > { %1375 = vmatpush.msrb.mxu3 %v2804_v28 }
 0x3fe   : > { %1353 = vmatpush.msrb.mxu2 %v2867_v52 }
 0x3ff   : > { %1376 = vmatpush.msrb.mxu3 %v2816_v8 }
 0x44c   : > { %v1099_v10 = vpop.f32.mrf.mxu0  ;;  %v1128_v61 = vpop.f32.mrf.mxu1 }
 0x451   : > { %v983_v11 = vpop.f32.mrf.mxu2  ;;  %v1012_v16 = vpop.f32.mrf.mxu3 }
 0x455   : > { %v1215_v34 = vpop.f32.mrf.mxu0 }
 0x456   : > { %1245 = vmatpush.msrb.mxu1 %v1215_v34 }
 0x45a   : > { %v1070_v24 = vpop.f32.mrf.mxu3  ;;  %v1041_v45 = vpop.f32.mrf.mxu2 }
 0x462   : > { %v1157_v49 = vpop.f32.mrf.mxu2 }
 0x463   : > { %v1186_v48 = vpop.f32.mrf.mxu3 }
 0x464   : > { %1246 = vmatpush.msrb.mxu1 %v1186_v48  ;;  %v1552_v48 = vld [vmem:[%s3344_s4 + $0x28] sm:$0xff] }
 0x466   : > { %1247 = vmatpush.msrb.mxu1 %v1157_v49  ;;  %v1550_v49 = vld [vmem:[%s3344_s4 + $0x18] sm:$0xff] }
 0x468   : > { %1248 = vmatpush.msrb.mxu1 %v1128_v61  ;;  %v1548_v61 = vld [vmem:[%s3344_s4 + $0x8] sm:$0xff] }
 0x46a   : > { %1249 = vmatpush.msrb.mxu1 %v1099_v10 }
 0x46c   : > { %1250 = vmatpush.msrb.mxu1 %v1070_v24  ;;  %v1478_v24 = vld [vmem:[%s3351_s11 + $0x10] sm:$0xff] }
 0x46e   : > { %1251 = vmatpush.msrb.mxu1 %v1041_v45  ;;  %v1554_v45 = vld [vmem:[%s3344_s4 + $0x38] sm:$0xff] }
 0x470   : > { %1252 = vmatpush.msrb.mxu1 %v1012_v16  ;;  %v3489_v16 = vld [vmem:[#allocation7_spill] sm:$0xff] }
 0x472   : > { %1253 = vmatpush.msrb.mxu1 %v983_v11  ;;  %v1476_v11 = vld [vmem:[%s3351_s11] sm:$0xff] }
 0x473   : > { %2051 = vmatmul.msk.f32.vlgmr.msrb.gmra.mxu1 %vm704_vm8, %v1218_v15 }
 0x474   : > { %1392 = vmatpush.msra.mxu1 %v2746_v39 }
 0x476   : > { %1393 = vmatpush.msra.mxu1 %v2758_v53 }
 0x478   : > { %1394 = vmatpush.msra.mxu1 %v2764_v63 }
 0x47a   : > { %1395 = vmatpush.msra.mxu1 %v2776_v5 }
 0x47b   : > { %2052 = vmatmul.msk.f32.gmra.mxu1 %vm704_vm8, %v1219_v62 }
 0x47c   : > { %1396 = vmatpush.msra.mxu1 %v2794_v22  ;;  %v1477_v22 = vld [vmem:[%s3351_s11 + $0x8] sm:$0xff] }
 0x47e   : > { %1397 = vmatpush.msra.mxu1 %v2806_v55 }
 0x480   : > { %1398 = vmatpush.msra.mxu1 %v2847_v3  ;;  %v1561_v3 = vld [vmem:[%s3344_s4 + $0x70] sm:$0xff] }
 0x482   : > { %1399 = vmatpush.msra.mxu1 %v2859_v19  ;;  %v2999_v19 = vpop.permute.xlu1 %1484 }
 0x48a   : > { %v1782_v26 = vpop.permute.xlu1 %1781 }
 0x48b   : > { %v1791_v32 = vsel %vm685_vm1, %v1782_v26, %v3486_v30  ;;  %v1794_v10 = vsel %vm685_vm1, %v3486_v30, %v1782_v26 }
 0x48c   : > { %v1799_v57 = vmul.f32 %v1791_v32, %v3488_v56  ;;  %v1800_v34 = vmul.f32 %v1794_v10, %v3489_v16  ;;  %v3494_v32 = vld [vmem:[#allocation12_spill] sm:$0xff] }
 0x4f0   : > { %v1255_v8 = vpop.f32.mrf.mxu1 }
 0x4f1   : > { %v1256_v9 = vadd.f32 %v1255_v8, %v2555_v47 }
 0x4f3   : > { %v1261_v52 = vmax.f32 %v1256_v9, 0.0 }
 0x4f5   : > { %2053 = vmatmul.msk.f32.vlgmr.msra.gmra.mxu2 %vm962_vm9, %v1261_v52  ;;  %2055 = vmatmul.msk.f32.vlgmr.msra.gmra.mxu3 %vm962_vm9, %v1261_v52 }
 0x4f6   : > { %2057 = vmatmul.msk.f32.vlgmr.msra.gmra.mxu0 %vm962_vm9, %v1261_v52  ;;  %2063 = vmatmul.msk.f32.vlgmr.msra.gmra.mxu1 %vm962_vm9, %v1261_v52 }
 0x4f7   : > { %1438 = vmatpush.msra.mxu2 %v2883_v6  ;;  %1461 = vmatpush.msra.mxu3 %v2826_v36  ;;  %v3480_v6 = vld [vmem:[#allocation42_spill] sm:$0xff]  ;;  %v1557_v36 = vld [vmem:[%s3344_s4 + $0x50] sm:$0xff] }
 0x4f8   : > { %v1258_v55 = vpop.f32.mrf.mxu1 }
 0x4f9   : > { %v1259_v59 = vadd.f32 %v1258_v55, %v2559_v51  ;;  %1439 = vmatpush.msra.mxu2 %v2889_v40  ;;  %1462 = vmatpush.msra.mxu3 %v2835_v23  ;;  %v3481_v51 = vld [vmem:[#allocation36_spill] sm:$0xff]  ;;  %v3482_v23 = vld [vmem:[#allocation37_spill] sm:$0xff]  ;;  %v3483_v40 = vld [vmem:[#allocation38_spill] sm:$0xff] }
 0x4fb   : > { %v1262_v47 = vmax.f32 %v1259_v59, 0.0  ;;  %1440 = vmatpush.msra.mxu2 %v3478_v60  ;;  %1463 = vmatpush.msra.mxu3 %v3479_v2 }
 0x4fd   : > { %2054 = vmatmul.msk.f32.gmra.mxu2 %vm962_vm9, %v1262_v47  ;;  %2056 = vmatmul.msk.f32.gmra.mxu3 %vm962_vm9, %v1262_v47 }
 0x4fe   : > { %2058 = vmatmul.msk.f32.gmra.mxu0 %vm962_vm9, %v1262_v47  ;;  %2064 = vmatmul.msk.f32.gmra.mxu1 %vm962_vm9, %v1262_v47 }
 0x4ff   : > { %1441 = vmatpush.msra.mxu2 %v3480_v6  ;;  %1464 = vmatpush.msra.mxu3 %v3481_v51 }
 0x501   : > { %1442 = vmatpush.msra.mxu2 %v2902_v46  ;;  %1465 = vmatpush.msra.mxu3 %v3482_v23  ;;  %v1559_v46 = vld [vmem:[%s3344_s4 + $0x60] sm:$0xff] }
 0x503   : > { %1443 = vmatpush.msra.mxu2 %v2907_v25  ;;  %1466 = vmatpush.msra.mxu3 %v3483_v40  ;;  %v1558_v25 = vld [vmem:[%s3344_s4 + $0x58] sm:$0xff] }
 0x505   : > { %1444 = vmatpush.msra.mxu2 %v2911_v54  ;;  %2061 = vmatmul.msk.f32.vlgmr.msrb.gmra.mxu3 %vm962_vm9, %v1261_v52  ;;  %v1556_v54 = vld [vmem:[%s3344_s4 + $0x48] sm:$0xff] }
 0x506   : > { %2059 = vmatmul.msk.f32.vlgmr.msrb.gmra.mxu2 %vm962_vm9, %v1261_v52  ;;  %2065 = vmatmul.msk.f32.vlgmr.msrb.gmra.mxu0 %vm962_vm9, %v1261_v52 }
 0x507   : > { %1445 = vmatpush.msra.mxu2 %v2915_v41  ;;  %1467 = vmatpush.msra.mxu3 %v3484_v35  ;;  %v1553_v41 = vld [vmem:[%s3344_s4 + $0x30] sm:$0xff]  ;;  %v1758_v35 = vpop.permute.xlu1 %1757 }
 0x509   : > { %1577 = vmatpush.msrb.mxu2 %v1561_v3  ;;  %1468 = vmatpush.msra.mxu3 %v3485_v18  ;;  %v3144_v18 = vpop.permute.xlu0 %1625 }
 0x50b   : > { %1578 = vmatpush.msrb.mxu2 %v1559_v46  ;;  %1600 = vmatpush.msrb.mxu3 %v1562_v50  ;;  %v1803_v46 = vld [vmem:[%s3354_s14] sm:$0xff] }
 0x50d   : > { %1579 = vmatpush.msrb.mxu2 %v1557_v36  ;;  %2062 = vmatmul.msk.f32.gmra.mxu3 %vm962_vm9, %v1262_v47 }
 0x50e   : > { %2066 = vmatmul.msk.f32.gmra.mxu0 %vm962_vm9, %v1262_v47  ;;  %2060 = vmatmul.msk.f32.gmra.mxu2 %vm962_vm9, %v1262_v47 }
 0x50f   : > { %1580 = vmatpush.msrb.mxu2 %v1555_v20  ;;  %1601 = vmatpush.msrb.mxu3 %v1560_v13  ;;  %v3142_v36 = vpop.permute.xlu1 %1733  ;;  %v3146_v20 = vpop.permute.xlu2 %1739 }
 0x511   : > { %1581 = vmatpush.msrb.mxu2 %v1553_v41  ;;  %1602 = vmatpush.msrb.mxu3 %v1558_v25 }
 0x513   : > { %1582 = vmatpush.msrb.mxu2 %v1551_v21  ;;  %1603 = vmatpush.msrb.mxu3 %v1556_v54 }
 0x515   : > { %1583 = vmatpush.msrb.mxu2 %v1549_v29  ;;  %2069 = vmatmul.msk.f32.vlgmr.msra.gmra.mxu3 %vm962_vm9, %v1261_v52 }
 0x516   : > { %2067 = vmatmul.msk.f32.vlgmr.msra.gmra.mxu2 %vm962_vm9, %v1261_v52  ;;  %1604 = vmatpush.msrb.mxu3 %v1554_v45 }
 0x517   : > { %1584 = vmatpush.msrb.mxu2 %v1547_v37  ;;  %v3152_v30 = vpop.permute.xlu2 %1619 }
 0x518   : > { %1605 = vmatpush.msrb.mxu3 %v1552_v48 }
 0x519   : > { %1838 = vmatpush.msra.mxu2 %v1799_v57  ;;  %v3495_v57 = vld [vmem:[#allocation13_spill] sm:$0xff] }
 0x51a   : > { %1606 = vmatpush.msrb.mxu3 %v1550_v49 }
 0x51c   : > { %1607 = vmatpush.msrb.mxu3 %v1548_v61  ;;  %v3502_v61 = vld [vmem:[#allocation32_spill] sm:$0xff] }
 0x51d   : > { %2070 = vmatmul.msk.f32.gmra.mxu3 %vm962_vm9, %v1262_v47 }
 0x51e   : > { %2068 = vmatmul.msk.f32.gmra.mxu2 %vm962_vm9, %v1262_v47  ;;  %v3490_v47 = vld [vmem:[#allocation24_spill] sm:$0xff] }
 0x573   : > { %v1332_v44 = vpop.f32.mrf.mxu0  ;;  %v1401_v12 = vpop.f32.mrf.mxu1 }
 0x578   : > { %v1286_v38 = vpop.f32.mrf.mxu2  ;;  %v1309_v39 = vpop.f32.mrf.mxu3 }
 0x57b   : > { %v1335_v0 = vpop.f32.mrf.mxu0  ;;  %v1404_v28 = vpop.f32.mrf.mxu1 }
 0x580   : > { %v1289_v42 = vpop.f32.mrf.mxu2  ;;  %v1312_v43 = vpop.f32.mrf.mxu3 }
 0x583   : > { %v1424_v7 = vpop.f32.mrf.mxu0 }
 0x588   : > { %v1378_v53 = vpop.f32.mrf.mxu3 }
 0x589   : > { %v1355_v58 = vpop.f32.mrf.mxu2 }
 0x58b   : > { %v1427_v27 = vpop.f32.mrf.mxu0 }
 0x590   : > { %v1381_v63 = vpop.f32.mrf.mxu3 }
 0x591   : > { %v1358_v1 = vpop.f32.mrf.mxu2 }
 0x598   : > { %v1470_v4 = vpop.f32.mrf.mxu3 }
 0x599   : > { %v1447_v5 = vpop.f32.mrf.mxu2 }
 0x5a0   : > { %v1473_v14 = vpop.f32.mrf.mxu3 }
 0x5a1   : > { %1536 = vmatpush.msra.mxu0 %v1473_v14  ;;  %v1450_v17 = vpop.f32.mrf.mxu2 }
 0x5a2   : > { %1499 = vmatpush.msrb.mxu1 %v1450_v17 }
 0x5a3   : > { %1537 = vmatpush.msra.mxu0 %v1470_v4 }
 0x5a4   : > { %2071 = vmatmul.msk.f32.vlgmr.msra.gmra.mxu0 %vm1492_vm10, %v1477_v22  ;;  %1500 = vmatpush.msrb.mxu1 %v1447_v5  ;;  %v3501_v5 = vld [vmem:[#allocation15_spill] sm:$0xff] }
 0x5a6   : > { %1501 = vmatpush.msrb.mxu1 %v1427_v27 }
 0x5a8   : > { %1502 = vmatpush.msrb.mxu1 %v1424_v7 }
 0x5aa   : > { %1503 = vmatpush.msrb.mxu1 %v1404_v28 }
 0x5ac   : > { %2072 = vmatmul.msk.f32.gmra.mxu0 %vm1492_vm10, %v1479_v33  ;;  %1504 = vmatpush.msrb.mxu1 %v1401_v12 }
 0x5ae   : > { %1505 = vmatpush.msrb.mxu1 %v1381_v63 }
 0x5b0   : > { %1506 = vmatpush.msrb.mxu1 %v1378_v53 }
 0x5b2   : > { %1507 = vmatpush.msrb.mxu1 %v1358_v1  ;;  %v3500_v1 = vld [vmem:[#allocation14_spill] sm:$0xff] }
 0x5b4   : > { %1508 = vmatpush.msrb.mxu1 %v1355_v58 }
 0x5b6   : > { %1509 = vmatpush.msrb.mxu1 %v1335_v0 }
 0x5b8   : > { %1510 = vmatpush.msrb.mxu1 %v1332_v44  ;;  %v3499_v44 = vld [vmem:[#allocation25_spill] sm:$0xff] }
 0x5ba   : > { %1511 = vmatpush.msrb.mxu1 %v1312_v43  ;;  %v3498_v43 = vld [vmem:[#allocation28_spill] sm:$0xff] }
 0x5bb   : > { %v1701_v53 = vsel %vm621_vm4, %v3499_v44, %v3498_v43  ;;  %v1704_v58 = vsel %vm621_vm4, %v3498_v43, %v3499_v44 }
 0x5bc   : > { %1512 = vmatpush.msrb.mxu1 %v1309_v39  ;;  %v3496_v39 = vld [vmem:[#allocation22_spill] sm:$0xff]  ;;  %v1709_v4 = vmul.f32 %v1704_v58, %v3500_v1  ;;  %v1710_v7 = vmul.f32 %v1701_v53, %v3501_v5  ;;  %v3505_v58 = vld [vmem:[#allocation16_spill] sm:$0xff] }
 0x5be   : > { %1513 = vmatpush.msrb.mxu1 %v1289_v42  ;;  %v3497_v42 = vld [vmem:[#allocation23_spill] sm:$0xff] }
 0x5c0   : > { %1514 = vmatpush.msrb.mxu1 %v1286_v38 }
 0x5c1   : > { %1515 = vmatmul.f32.vlgmr.msrb.gmra.mxu1 %v1476_v11 }
 0x5c2   : > { %1878 = vmatpush.msra.mxu1 %v1800_v34 }
 0x5c9   : > { %1518 = vmatmul.f32.gmra.mxu1 %v1478_v24 }
 0x621   : > { %v1539_v15 = vpop.f32.mrf.mxu0 }
 0x629   : > { %v1542_v59 = vpop.f32.mrf.mxu0 }
 0x63e   : > { %v1516_v62 = vpop.f32.mrf.mxu1 }
 0x63f   : > { %v1517_v8 = vadd.f32 %v1516_v62, %v2999_v19  ;;  %v1896_v19 = vld [vmem:[%s3356_s16] sm:$0x7]  ;;  %v1770_v62 = vsel %vm669_vm0, %v3502_v61, %v1758_v35 }
 0x641   : > { %v1540_v9 = vadd.f32 %v1539_v15, %v1517_v8  ;;  %v1767_v15 = vsel %vm669_vm0, %v1758_v35, %v3502_v61  ;;  %v3513_v61 = vld [vmem:[#allocation19_spill] sm:$0xff] }
 0x643   : > { %v1545_v52 = vmax.f32 %v1540_v9, 0.0 }
 0x645   : > { %2073 = vmatmul.msk.f32.vlgmr.msrb.gmra.mxu2 %vm962_vm9, %v1545_v52  ;;  %2075 = vmatmul.msk.f32.vlgmr.msrb.gmra.mxu3 %vm962_vm9, %v1545_v52  ;;  %v3503_v52 = vld [vmem:[#allocation8_spill] sm:$0xff] }
 0x646   : > { %v1519_v55 = vpop.f32.mrf.mxu1 }
 0x647   : > { %v1520_v60 = vadd.f32 %v1519_v55, %v3490_v47  ;;  %v1775_v55 = vmul.f32 %v1767_v15, %v3503_v52  ;;  %v3514_v15 = vld [vmem:[#allocation33_spill] sm:$0xff] }
 0x649   : > { %v1543_v2 = vadd.f32 %v1542_v59, %v1520_v60  ;;  %v3504_v59 = vld [vmem:[#allocation9_spill] sm:$0xff] }
 0x64a   : > { %v1776_v47 = vmul.f32 %v1770_v62, %v3504_v59  ;;  %v1662_v62 = vmul.f32 %v3514_v15, %v3513_v61 }
 0x64b   : > { %v1546_v6 = vmax.f32 %v1543_v2, 0.0 }
 0x64d   : > { %2074 = vmatmul.msk.f32.gmra.mxu2 %vm962_vm9, %v1546_v6  ;;  %2076 = vmatmul.msk.f32.gmra.mxu3 %vm962_vm9, %v1546_v6 }
 0x6c8   : > { %v3084_v51 = vpop.f32.mrf.mxu2  ;;  %v3086_v23 = vpop.f32.mrf.mxu3 }
 0x6c9   : > { %1693 = vrot.lane.b32.xlu2 %v3086_v23, %s3491_s27  ;;  %1715 = vrot.lane.b32.xlu1 %v3086_v23, %s3492_s0 }
 0x6ca   : > { %1711 = vrot.lane.b32.xlu0 %v3084_v51, %s3492_s0 }
 0x6d0   : > { %v1589_v40 = vpop.f32.mrf.mxu2  ;;  %v1612_v3 = vpop.f32.mrf.mxu3 }
 0x6d1   : > { %1669 = vrot.lane.b32.xlu2 %v3086_v23, %s3493_s5  ;;  %1687 = vrot.lane.b32.xlu1 %v3084_v51, %s3491_s27 }
 0x6d2   : > { %1777 = vrot.lane.b32.xlu0 %v3084_v51, %s3464_s30 }
 0x6d9   : > { %1645 = vrot.lane.b32.xlu2 %v3086_v23, %s3453_s1  ;;  %1783 = vrot.lane.b32.xlu1 %v3086_v23, %s3464_s30 }
 0x6da   : > { %1753 = vrot.lane.b32.xlu0 %v3084_v51, %s3466_s22 }
 0x6e1   : > { %1663 = vrot.lane.b32.xlu1 %v3084_v51, %s3493_s5  ;;  %1779 = vrot.lane.b32.xlu2 %v1589_v40, %s3464_s30 }
 0x6e2   : > { %1729 = vrot.lane.b32.xlu0 %v3084_v51, %s3469_s25 }
 0x6e9   : > { %1759 = vrot.lane.b32.xlu1 %v3086_v23, %s3466_s22  ;;  %1755 = vrot.lane.b32.xlu2 %v1589_v40, %s3466_s22 }
 0x6ea   : > { %1689 = vrot.lane.b32.xlu0 %v1589_v40, %s3491_s27 }
 0x6f1   : > { %1639 = vrot.lane.b32.xlu1 %v3084_v51, %s3453_s1  ;;  %1731 = vrot.lane.b32.xlu2 %v1589_v40, %s3469_s25 }
 0x6f2   : > { %1785 = vrot.lane.b32.xlu0 %v1612_v3, %s3464_s30 }
 0x6f9   : > { %1735 = vrot.lane.b32.xlu1 %v3086_v23, %s3469_s25  ;;  %1623 = vrot.lane.b32.xlu2 %v1612_v3, %s3452_s19 }
 0x6fa   : > { %1665 = vrot.lane.b32.xlu0 %v1589_v40, %s3493_s5 }
 0x701   : > { %1695 = vrot.lane.b32.xlu1 %v1612_v3, %s3491_s27  ;;  %1615 = vrot.lane.b32.xlu2 %v3084_v51, %s3452_s19 }
 0x702   : > { %1761 = vrot.lane.b32.xlu0 %v1612_v3, %s3466_s22 }
 0x709   : > { %1671 = vrot.lane.b32.xlu1 %v1612_v3, %s3493_s5  ;;  %1899 = vperm.xlu2 %2122, %v1896_v19  }
 0x70a   : > { %1641 = vrot.lane.b32.xlu0 %v1589_v40, %s3453_s1 }
 0x711   : > { %1647 = vrot.lane.b32.xlu1 %v1612_v3, %s3453_s1 }
 0x712   : > { %1737 = vrot.lane.b32.xlu0 %v1612_v3, %s3469_s25 }
 0x719   : > { %1617 = vrot.lane.b32.xlu1 %v1589_v40, %s3452_s19 }
 0x71a   : > { %1713 = vrot.lane.b32.xlu0 %v1589_v40, %s3492_s0 }
 0x721   : > { %1717 = vrot.lane.b32.xlu1 %v1612_v3, %s3492_s0  ;;  %s565_s0 = scalar_lea.vmem %s3357_s17, %s2084_s18 }
 0x722   : > { %1621 = vrot.lane.b32.xlu0 %v3086_v23, %s3452_s19 }
 0x723   : > { %v1694_v12 = vpop.permute.xlu2 %1693 }
 0x729   : > { %1806 = vperm.xlu1 %2115, %v1803_v46  }
 0x72b   : > { %v3170_v22 = vpop.permute.xlu2 %1669 }
 0x733   : > { %v3176_v33 = vpop.permute.xlu2 %1645 }
 0x73b   : > { %v1716_v41 = vpop.permute.xlu1 %1715  ;;  %v1780_v54 = vpop.permute.xlu2 %1779 }
 0x73c   : > { %v1712_v21 = vpop.permute.xlu0 %1711 }
 0x73d   : > { %v1719_v26 = vsel %vm637_vm3, %v1712_v21, %v1716_v41  ;;  %v1721_v29 = vsel %vm637_vm3, %v1716_v41, %v1712_v21 }
 0x73e   : > { %v1723_v37 = vmul.f32 %v1719_v26, %v3494_v32  ;;  %v1724_v38 = vmul.f32 %v1721_v29, %v3495_v57  ;;  %v1743_v29 = vsel %vm653_vm2, %v3142_v36, %v3146_v20 }
 0x740   : > { %1813 = vmatpush.msrb.mxu0 %v1723_v37  ;;  %1853 = vmatpush.msra.mxu3 %v1724_v38 }
 0x742   : > { %1814 = vmatpush.msrb.mxu0 %v3496_v39  ;;  %1854 = vmatpush.msra.mxu3 %v3497_v42  ;;  %v1746_v39 = vsel %vm653_vm2, %v3146_v20, %v3142_v36  ;;  %v3509_v36 = vld [vmem:[#allocation10_spill] sm:$0xff] }
 0x743   : > { %v1688_v63 = vpop.permute.xlu1 %1687  ;;  %v1751_v20 = vmul.f32 %v1743_v29, %v3509_v36  ;;  %v3518_v29 = vld [vmem:[#allocation27_spill] sm:$0xff] }
 0x744   : > { %1815 = vmatpush.msrb.mxu0 %v1589_v40  ;;  %1855 = vmatpush.msra.mxu3 %v1612_v3  ;;  %v1778_v0 = vpop.permute.xlu0 %1777  ;;  %v1699_v6 = vsel %vm621_vm4, %v1688_v63, %v1694_v12 }
 0x745   : > { %v1706_v43 = vmul.f32 %v1699_v6, %v3501_v5 }
 0x746   : > { %1816 = vmatpush.msrb.mxu0 %v3084_v51  ;;  %1856 = vmatpush.msra.mxu3 %v3086_v23  ;;  %v1756_v51 = vpop.permute.xlu2 %1755 }
 0x748   : > { %1817 = vmatpush.msrb.mxu0 %v1709_v4  ;;  %1857 = vmatpush.msra.mxu3 %v1710_v7  ;;  %v3507_v4 = vld [vmem:[#allocation17_spill] sm:$0xff]  ;;  %v3508_v7 = vld [vmem:[#allocation30_spill] sm:$0xff] }
 0x74b   : > { %v1784_v14 = vpop.permute.xlu1 %1783 }
 0x74c   : > { %v1754_v17 = vpop.permute.xlu0 %1753  ;;  %v1789_v11 = vsel %vm685_vm1, %v1778_v0, %v1784_v14  ;;  %v1792_v34 = vsel %vm685_vm1, %v1784_v14, %v1778_v0 }
 0x74d   : > { %v1795_v8 = vmul.f32 %v1789_v11, %v3488_v56  ;;  %v1796_v9 = vmul.f32 %v1792_v34, %v3489_v16 }
 0x753   : > { %v3172_v27 = vpop.permute.xlu1 %1663 }
 0x754   : > { %v3174_v28 = vpop.permute.xlu0 %1729  ;;  %v1675_v14 = vsel %vm605_vm5, %v3172_v27, %v3170_v22 }
 0x75b   : > { %v1760_v50 = vpop.permute.xlu1 %1759 }
 0x75c   : > { %v1690_v13 = vpop.permute.xlu0 %1689  ;;  %v1765_v23 = vsel %vm669_vm0, %v1754_v17, %v1760_v50  ;;  %v1768_v40 = vsel %vm669_vm0, %v1760_v50, %v1754_v17  ;;  %v1678_v50 = vsel %vm605_vm5, %v3170_v22, %v3172_v27  ;;  %v1732_v22 = vpop.permute.xlu2 %1731  ;;  %v3511_v27 = vld [vmem:[#allocation18_spill] sm:$0xff] }
 0x75d   : > { %v1771_v44 = vmul.f32 %v1765_v23, %v3503_v52  ;;  %v1772_v53 = vmul.f32 %v1768_v40, %v3504_v59 }
 0x763   : > { %v3178_v25 = vpop.permute.xlu1 %1639 }
 0x764   : > { %v1786_v10 = vpop.permute.xlu0 %1785 }
 0x765   : > { %v1790_v24 = vsel %vm685_vm1, %v1780_v54, %v1786_v10  ;;  %v1793_v45 = vsel %vm685_vm1, %v1786_v10, %v1780_v54 }
 0x766   : > { %v1797_v48 = vmul.f32 %v1790_v24, %v3488_v56  ;;  %v1798_v49 = vmul.f32 %v1793_v45, %v3489_v16  ;;  %v1702_v56 = vsel %vm621_vm4, %v1694_v12, %v1688_v63  ;;  %v3506_v63 = vld [vmem:[#allocation31_spill] sm:$0xff]  ;;  %v1686_v12 = vmul.f32 %v3508_v7, %v3507_v4 }
 0x767   : > { %v1705_v42 = vmul.f32 %v1702_v56, %v3500_v1  ;;  %v1685_v0 = vmul.f32 %v3506_v63, %v3505_v58  ;;  %v1681_v24 = vmul.f32 %v1678_v50, %v3505_v58  ;;  %v1682_v45 = vmul.f32 %v1675_v14, %v3507_v4  ;;  %v1801_v50 = vld [vmem:[%s3353_s13] sm:$0xff] }
 0x768   : > { %1839 = vmatpush.msra.mxu2 %v1797_v48  ;;  %1879 = vmatpush.msra.mxu1 %v1798_v49  ;;  %v3512_v48 = vld [vmem:[#allocation34_spill] sm:$0xff] }
 0x769   : > { %v1661_v49 = vmul.f32 %v3512_v48, %v3511_v27 }
 0x76a   : > { %1840 = vmatpush.msra.mxu2 %v1795_v8  ;;  %1880 = vmatpush.msra.mxu1 %v1796_v9  ;;  %v1651_v8 = vsel %vm589_vm6, %v3178_v25, %v3176_v33  ;;  %v1654_v9 = vsel %vm589_vm6, %v3176_v33, %v3178_v25 }
 0x76b   : > { %v3200_v60 = vpop.permute.xlu1 %1735  ;;  %v1657_v40 = vmul.f32 %v1654_v9, %v3511_v27 }
 0x76c   : > { %1841 = vmatpush.msra.mxu2 %v1775_v55  ;;  %1881 = vmatpush.msra.mxu1 %v1776_v47  ;;  %v1666_v2 = vpop.permute.xlu0 %1665  ;;  %v1741_v55 = vsel %vm653_vm2, %v3174_v28, %v3200_v60 }
 0x773   : > { %v1696_v16 = vpop.permute.xlu1 %1695 }
 0x774   : > { %v1700_v3 = vsel %vm621_vm4, %v1690_v13, %v1696_v16  ;;  %v1703_v19 = vsel %vm621_vm4, %v1696_v16, %v1690_v13  ;;  %v1762_v46 = vpop.permute.xlu0 %1761 }
 0x775   : > { %v1707_v35 = vmul.f32 %v1703_v19, %v3500_v1  ;;  %v1708_v41 = vmul.f32 %v1700_v3, %v3501_v5  ;;  %v1766_v21 = vsel %vm669_vm0, %v1756_v51, %v1762_v46  ;;  %v1769_v26 = vsel %vm669_vm0, %v1762_v46, %v1756_v51  ;;  %v3510_v1 = vld [vmem:[#allocation11_spill] sm:$0xff] }
 0x776   : > { %v1773_v37 = vmul.f32 %v1766_v21, %v3503_v52  ;;  %v1774_v38 = vmul.f32 %v1769_v26, %v3504_v59  ;;  %v1752_v5 = vmul.f32 %v1746_v39, %v3510_v1  ;;  %v1744_v59 = vsel %vm653_vm2, %v3200_v60, %v3174_v28  ;;  %v3516_v21 = vld [vmem:[#allocation21_spill] sm:$0xff] }
 0x777   : > { %1818 = vmatpush.msrb.mxu0 %v1707_v35  ;;  %1858 = vmatpush.msra.mxu3 %v1708_v41  ;;  %v1629_v28 = vsel %vm574_vm7, %v3152_v30, %v3144_v18  ;;  %v1632_v60 = vsel %vm574_vm7, %v3144_v18, %v3152_v30  ;;  %v1658_v3 = vmul.f32 %v1651_v8, %v3513_v61  ;;  %v3515_v35 = vld [vmem:[#allocation20_spill] sm:$0xff]  ;;  %v3517_v30 = vld [vmem:[#allocation26_spill] sm:$0xff] }
 0x778   : > { %1842 = vmatpush.msra.mxu2 %v1773_v37  ;;  %1882 = vmatpush.msra.mxu1 %v1774_v38  ;;  %v1747_v19 = vmul.f32 %v1741_v55, %v3509_v36  ;;  %v1748_v46 = vmul.f32 %v1744_v59, %v3510_v1  ;;  %v1637_v41 = vmul.f32 %v1632_v60, %v3515_v35  ;;  %v1624_v38 = vpop.permute.xlu2 %1623 }
 0x779   : > { %1819 = vmatpush.msrb.mxu0 %v1705_v42  ;;  %1859 = vmatpush.msra.mxu3 %v1706_v43  ;;  %v1638_v18 = vmul.f32 %v1629_v28, %v3516_v21  ;;  %v1727_v26 = vmul.f32 %v3517_v30, %v3494_v32  ;;  %v1728_v37 = vmul.f32 %v3518_v29, %v3495_v57 }
 0x77a   : > { %1843 = vmatpush.msra.mxu2 %v1771_v44  ;;  %1883 = vmatpush.msra.mxu1 %v1772_v53 }
 0x77b   : > { %v1672_v17 = vpop.permute.xlu1 %1671  ;;  %1820 = vmatpush.msrb.mxu0 %v1685_v0  ;;  %1860 = vmatpush.msra.mxu3 %v1686_v12 }
 0x77c   : > { %v1676_v13 = vsel %vm605_vm5, %v1666_v2, %v1672_v17  ;;  %v1679_v54 = vsel %vm605_vm5, %v1672_v17, %v1666_v2  ;;  %1844 = vmatpush.msra.mxu2 %v1751_v20  ;;  %1884 = vmatpush.msra.mxu1 %v1752_v5  ;;  %v1642_v10 = vpop.permute.xlu0 %1641 }
 0x77d   : > { %v1683_v11 = vmul.f32 %v1679_v54, %v3505_v58  ;;  %v1684_v34 = vmul.f32 %v1676_v13, %v3507_v4 }
 0x77f   : > { %1821 = vmatpush.msrb.mxu0 %v1683_v11  ;;  %1861 = vmatpush.msra.mxu3 %v1684_v34 }
 0x780   : > { %v1616_v0 = vpop.permute.xlu2 %1615 }
 0x781   : > { %1822 = vmatpush.msrb.mxu0 %v1681_v24  ;;  %1862 = vmatpush.msra.mxu3 %v1682_v45 }
 0x783   : > { %v1648_v52 = vpop.permute.xlu1 %1647  ;;  %1823 = vmatpush.msrb.mxu0 %v1661_v49  ;;  %1863 = vmatpush.msra.mxu3 %v1662_v62 }
 0x784   : > { %v1652_v47 = vsel %vm589_vm6, %v1642_v10, %v1648_v52  ;;  %v1655_v2 = vsel %vm589_vm6, %v1648_v52, %v1642_v10  ;;  %v1738_v33 = vpop.permute.xlu0 %1737 }
 0x785   : > { %v1659_v25 = vmul.f32 %v1655_v2, %v3511_v27  ;;  %v1660_v6 = vmul.f32 %v1652_v47, %v3513_v61  ;;  %v1742_v56 = vsel %vm653_vm2, %v1732_v22, %v1738_v33  ;;  %v1745_v16 = vsel %vm653_vm2, %v1738_v33, %v1732_v22  ;;  %v1895_v22 = vld [vmem:[%s3355_s15] sm:$0x7] }
 0x786   : > { %v1749_v51 = vmul.f32 %v1742_v56, %v3509_v36  ;;  %v1750_v23 = vmul.f32 %v1745_v16, %v3510_v1 }
 0x787   : > { %1824 = vmatpush.msrb.mxu0 %v1659_v25  ;;  %1864 = vmatpush.msra.mxu3 %v1660_v6 }
 0x788   : > { %1845 = vmatpush.msra.mxu2 %v1749_v51  ;;  %1885 = vmatpush.msra.mxu1 %v1750_v23  ;;  %v1900_v49 = vpop.permute.xlu2 %1899 }
 0x789   : > { %1825 = vmatpush.msrb.mxu0 %v1657_v40  ;;  %1865 = vmatpush.msra.mxu3 %v1658_v3 }
 0x78a   : > { %1846 = vmatpush.msra.mxu2 %v1747_v19  ;;  %1886 = vmatpush.msra.mxu1 %v1748_v46 }
 0x78b   : > { %v1618_v39 = vpop.permute.xlu1 %1617  ;;  %1826 = vmatpush.msrb.mxu0 %v1637_v41  ;;  %1866 = vmatpush.msra.mxu3 %v1638_v18 }
 0x78c   : > { %v1628_v42 = vsel %vm574_vm7, %v1618_v39, %v1624_v38  ;;  %v1631_v43 = vsel %vm574_vm7, %v1624_v38, %v1618_v39  ;;  %1847 = vmatpush.msra.mxu2 %v1727_v26  ;;  %1887 = vmatpush.msra.mxu1 %v1728_v37  ;;  %v1714_v44 = vpop.permute.xlu0 %1713 }
 0x78d   : > { %v1635_v53 = vmul.f32 %v1631_v43, %v3515_v35  ;;  %v1636_v58 = vmul.f32 %v1628_v42, %v3516_v21 }
 0x78f   : > { %1827 = vmatpush.msrb.mxu0 %v1635_v53  ;;  %1867 = vmatpush.msra.mxu3 %v1636_v58 }
 0x793   : > { %v1718_v63 = vpop.permute.xlu1 %1717 }
 0x794   : > { %v1720_v4 = vsel %vm637_vm3, %v1714_v44, %v1718_v63  ;;  %v1722_v7 = vsel %vm637_vm3, %v1718_v63, %v1714_v44  ;;  %v1622_v12 = vpop.permute.xlu0 %1621 }
 0x795   : > { %v1725_v36 = vmul.f32 %v1720_v4, %v3494_v32  ;;  %v1726_v20 = vmul.f32 %v1722_v7, %v3495_v57  ;;  %v1627_v1 = vsel %vm574_vm7, %v1616_v0, %v1622_v12  ;;  %v1630_v5 = vsel %vm574_vm7, %v1622_v12, %v1616_v0  ;;  %v1802_v32 = vld [vmem:[%s3353_s13 + $0x8] sm:$0xff] }
 0x796   : > { %v1633_v14 = vmul.f32 %v1630_v5, %v3515_v35  ;;  %v1634_v17 = vmul.f32 %v1627_v1, %v3516_v21 }
 0x797   : > { %1848 = vmatpush.msra.mxu2 %v1725_v36  ;;  %1888 = vmatpush.msra.mxu1 %v1726_v20 }
 0x798   : > { %1828 = vmatpush.msrb.mxu0 %v1633_v14  ;;  %1868 = vmatpush.msra.mxu3 %v1634_v17 }
 0x799   : > { %1829 = vmatmul.f32.vlgmr.msrb.gmra.mxu0 %v1801_v50  ;;  %2077 = vmatmul.msk.f32.vlgmr.msra.gmra.mxu2 %vm1809_vm11, %v1802_v32 }
 0x79a   : > { %1869 = vmatmul.f32.vlgmr.msra.gmra.mxu3 %v1801_v50  ;;  %2078 = vmatmul.msk.f32.vlgmr.msra.gmra.mxu1 %vm1809_vm11, %v1802_v32 }
 0x79b   : > { %v1807_v57 = vpop.permute.xlu1 %1806 }
 0x816   : > { %v1830_v31 = vpop.f32.mrf.mxu0 }
 0x817   : > { %v1831_v13 = vadd.f32 %v1830_v31, %v1807_v57  ;;  %v1890_v34 = vpop.f32.mrf.mxu1 }
 0x81c   : > { %v1850_v54 = vpop.f32.mrf.mxu2 }
 0x81d   : > { %v1851_v10 = vadd.f32 %v1850_v54, %v1831_v13  ;;  %v1870_v11 = vpop.f32.mrf.mxu3 }
 0x81e   : > { %v1871_v24 = vadd.f32 %v1870_v11, %v1807_v57 }
 0x81f   : > { %v1893_v45 = vmax.f32 %v1851_v10, 0.0 }
 0x820   : > { %v1891_v27 = vadd.f32 %v1890_v34, %v1871_v24 }
 0x821   : > { %1921 = vmatpush.msrb.mxu2 %v1893_v45 }
 0x822   : > { %v1894_v48 = vmax.f32 %v1891_v27, 0.0  ;;  %2079 = vmatmul.msk.f32.vlgmr.msrb.gmra.mxu2 %vm1902_vm12, %v1895_v22 }
 0x824   : > { %1941 = vmatpush.msrb.mxu1 %v1894_v48 }
 0x825   : > { %2080 = vmatmul.msk.f32.vlgmr.msrb.gmra.mxu1 %vm1902_vm12, %v1895_v22 }
 0x8a2   : > { %v1943_v61 = vpop.f32.mrf.mxu1 }
 0x8a3   : > { %v1944_v15 = vadd.f32 %v1943_v61, %v1900_v49 }
 0x8a5   : > { %v1923_v62 = vpop.f32.mrf.mxu2  ;;  %v1948_v8 = vrot.slane %v1944_v15, 4 }
 0x8a6   : > { %v1924_v9 = vadd.f32 %v1923_v62, %v1900_v49 }
 0x8a8   : > { %v1950_v52 = vsel %vm1949_vm13, %v1924_v9, %v1948_v8 }
 0x8a9   : > { %1952 = vst [vmem:[%s565_s0] sm:$0x77] %v1950_v52 }
 0x8aa PF: > { %s28_s24 = sadd.s32 1, %s2163_s24  }
 0x8ab   : > { %p25_p7 = scmp.ge.s32.totalorder %s28_s24, 4  }
 0x8ad   :  { %27 = sbr.rel (!%p25_p7) target bundleno = 7 (0x7), region = 138 }
 0x8b2   :  { %1974 = vsyncpa [#allocation3], 1 }
 0x8b3   :  { %1976 = vsyncpa [#allocation3 + $0x1], 1 }

</bundles_post_ra>
